<compile_context>
chip_gen: v5e
topology: v5e:2x2
jax: 0.10.0
libtpu: 0.0.40
codegen_flags: <defaults>
</compile_context>

<pallas_src>
import numpy as np
import jax
import jax.numpy as jnp
from jax import lax
from jax.experimental import pallas as pl
from jax.experimental.pallas import tpu as pltpu

_LANE = 128
_EPS = 1e-5
_VMEM_LIMIT = 32 * 1024 * 1024  # safe on v5e/v6e (128 MiB) and v7x (64 MiB)


def _round_up(x, m):
    return ((x + m - 1) // m) * m


def _largest_tile(total, target, step):
    """Largest multiple of `step` that divides `total` and is <= target.

    Falls back to `total` (full-extent block, always legal) if none exists.
    """
    target = max(step, min(target, total))
    best = None
    t = step
    while t <= target:
        if total % t == 0:
            best = t
        t += step
    return best if best is not None else total


# ---------------------------------------------------------------------------
# Pass 1: conv as im2col matmul (MXU, bf16 inputs / f32 accumulate)
#         + per-tile partial BN statistics (sum, centered sum of squares).
# ---------------------------------------------------------------------------
def conv_stats_kernel(patches_ref, wmat_ref, y_ref, stats_ref):
    y = jnp.dot(patches_ref[...], wmat_ref[...],
                preferred_element_type=jnp.float32)        # (TM, Cp) f32
    y_ref[...] = y.astype(y_ref.dtype)                     # bf16 writeback

    inv_n = 1.0 / y.shape[0]
    s = jnp.sum(y, axis=0, keepdims=True)                  # (1, Cp) tile sum
    mu = s * inv_n                                         # per-tile mean
    d = y - mu
    m2 = jnp.sum(d * d, axis=0, keepdims=True)             # centered sum-sq
    # Only rows 0 and 1 carry data; rows 2..7 are never read by the glue.
    stats_ref[0:1, :] = s
    stats_ref[1:2, :] = m2


# ---------------------------------------------------------------------------
# Pass 2: folded BatchNorm affine (with 0.25 pool factor) + ReLU + 2x2 pool.
# y_ref is (TPH, 2, PW, 2*Cp): the lane dim interleaves (dx, channel) and the
# size-2 dim is dy, so the 4 members of each pooling window are static slices.
# ---------------------------------------------------------------------------
def bn_relu_pool_kernel(y_ref, scale_ref, shift_ref, out_ref):
    y = y_ref[...]                                         # (TPH, 2, PW, 2*Cp) bf16
    # scale/shift are (1, 2*Cp) with the per-channel values tiled across dx.
    z = jnp.maximum(y * scale_ref[...] + shift_ref[...], 0.0)   # f32
    cp = out_ref.shape[-1]
    out_ref[...] = (z[:, 0, :, :cp] + z[:, 0, :, cp:]
                    + z[:, 1, :, :cp] + z[:, 1, :, cp:])


# ---------------------------------------------------------------------------
# Wrapper / glue
# ---------------------------------------------------------------------------
def down_block_2d(x, w, b, gamma, beta, *, tile_rows=1024, tile_pool_pixels=1024):
    """x: (N, Cin, H, W) f32 -> (N, Cout, H//2, W//2) f32.

    `b` (conv bias) is accepted for interface parity with nn.Conv2d but is not
    used: training-mode BatchNorm subtracts the batch mean, which cancels any
    per-channel constant added by the conv.
    """
    del b  # cancelled by BN mean subtraction
    N, Cin, H, W = x.shape
    Cout, _, K, _ = w.shape
    OH, OW = H, W                      # k=3, pad=1, stride=1 -> same spatial
    PH, PW = OH // 2, OW // 2
    CK = Cin * K * K

    Kp = _round_up(CK, _LANE)          # contraction dim padded to lane width
    Cp = _round_up(Cout, _LANE)        # output channels padded to lane width
    # NOTE: for very small Cout (like the test's 8) lane padding to 128 wastes
    # bandwidth; realistic DownBlock2d widths (>=64) are already lane-dense.
    NP = N * OH * OW                   # conv pixels (rows, natural n/oh/ow order)
    NQ = N * PH * PW                   # pooled pixels
    NPH = N * PH                       # pooled-row count (pass-2 leading dim)

    # --- im2col built in bf16, directly in the final padded layout ------------
    xb = x.astype(jnp.bfloat16)
    xp = jnp.pad(xb, ((0, 0), (0, 0), (1, 1), (1, 1)))
    cols = [xp[:, :, kh:kh + OH, kw:kw + OW] for kh in range(K) for kw in range(K)]
    patches = jnp.stack(cols, axis=2)                       # (N, Cin, K*K, OH, OW)
    patches = patches.transpose(0, 3, 4, 1, 2).reshape(NP, CK)   # rows (n,oh,ow)
    patches = jnp.pad(patches, ((0, 0), (0, Kp - CK)))      # stays bf16

    # weight matrix (Cin*K*K, Cout) -> padded (Kp, Cp), bf16 MXU input
    wmat = w.reshape(Cout, CK).T.astype(jnp.float32)
    wmat = jnp.pad(wmat, ((0, Kp - CK), (0, Cp - Cout))).astype(jnp.bfloat16)

    # tm divides NP exactly so no row padding (keeps the pass-2 reshape free
    # and the per-tile BN counts uniform).
    tm = _largest_tile(NP, tile_rows, 8)
    n_tiles = NP // tm

    y_nat, stats = pl.pallas_call(
        conv_stats_kernel,
        out_shape=(jax.ShapeDtypeStruct((NP, Cp), jnp.bfloat16),
                   jax.ShapeDtypeStruct((n_tiles * 8, Cp), jnp.float32)),
        grid=(n_tiles,),
        in_specs=[pl.BlockSpec((tm, Kp), lambda i: (i, 0)),
                  pl.BlockSpec((Kp, Cp), lambda i: (0, 0))],
        out_specs=(pl.BlockSpec((tm, Cp), lambda i: (i, 0)),
                   pl.BlockSpec((8, Cp), lambda i: (i, 0))),
        compiler_params=pltpu.CompilerParams(
            dimension_semantics=("parallel",),
            vmem_limit_bytes=_VMEM_LIMIT),
    )(patches, wmat)

    # --- combine per-tile stats (Chan-style), fold BN affine + 0.25 pool ------
    st = stats.reshape(n_tiles, 8, Cp)
    tile_sums = st[:, 0, :]                                  # (n_tiles, Cp)
    tile_m2 = st[:, 1, :]
    mean = tile_sums.sum(axis=0) / NP
    tile_means = tile_sums / tm
    var = (tile_m2.sum(axis=0)
           + (tm * (tile_means - mean[None, :]) ** 2).sum(axis=0)) / NP
    var = jnp.maximum(var, 0.0)

    gamma_p = jnp.pad(gamma.astype(jnp.float32), (0, Cp - Cout))
    beta_p = jnp.pad(beta.astype(jnp.float32), (0, Cp - Cout))
    inv_std = lax.rsqrt(var + _EPS)
    scale = gamma_p * inv_std * 0.25                         # 0.25 = avg-pool factor
    shift = (beta_p - mean * gamma_p * inv_std) * 0.25
    # lane dim of pass 2 interleaves (dx, channel) -> tile per-channel vectors
    scale2 = jnp.tile(scale.reshape(1, Cp), (1, 2))          # (1, 2*Cp)
    shift2 = jnp.tile(shift.reshape(1, Cp), (1, 2))

    # --- pass 2: normalize + ReLU + 2x2 pool ----------------------------------
    # Free dim-regrouping of the natural (n, ph, dy, pw, dx, c) row order.
    y5 = y_nat.reshape(NPH, 2, PW, 2 * Cp)
    tph = _largest_tile(NPH, max(1, tile_pool_pixels // PW), 1)
    n_ptiles = NPH // tph

    out3 = pl.pallas_call(
        bn_relu_pool_kernel,
        out_shape=jax.ShapeDtypeStruct((NPH, PW, Cp), jnp.float32),
        grid=(n_ptiles,),
        in_specs=[pl.BlockSpec((tph, 2, PW, 2 * Cp), lambda i: (i, 0, 0, 0)),
                  pl.BlockSpec((1, 2 * Cp), lambda i: (0, 0)),
                  pl.BlockSpec((1, 2 * Cp), lambda i: (0, 0))],
        out_specs=pl.BlockSpec((tph, PW, Cp), lambda i: (i, 0, 0)),
        compiler_params=pltpu.CompilerParams(
            dimension_semantics=("parallel",),
            vmem_limit_bytes=_VMEM_LIMIT),
    )(y5, scale2, shift2)

    # rows are ordered (n, ph); slice off channel padding -> NCHW
    return out3[:, :, :Cout].reshape(N, PH, PW, Cout).transpose(0, 3, 1, 2)


# ---------------------------------------------------------------------------
# Pure-JAX f32 reference (mirrors the PyTorch module in training mode)
# ---------------------------------------------------------------------------
def down_block_2d_reference(x, w, b, gamma, beta):
    N, Cin, H, W = x.shape
    Cout = w.shape[0]
    conv = lax.conv_general_dilated(
        x, w, window_strides=(1, 1), padding=((1, 1), (1, 1)),
        dimension_numbers=("NCHW", "OIHW", "NCHW")) + b[None, :, None, None]
    mu = conv.mean(axis=(0, 2, 3), keepdims=True)
    var = ((conv - mu) ** 2).mean(axis=(0, 2, 3), keepdims=True)
    bn = (conv - mu) / jnp.sqrt(var + _EPS)
    bn = bn * gamma[None, :, None, None] + beta[None, :, None, None]
    r = jnp.maximum(bn, 0.0)
    return r.reshape(N, Cout, H // 2, 2, W // 2, 2).mean(axis=(3, 5))


if __name__ == "__main__":
    N, Cin, Cout, H, W = 2, 4, 8, 16, 16
    key = jax.random.PRNGKey(0)
    kx, kw, kb, kg, kbe = jax.random.split(key, 5)

    x = jax.random.normal(kx, (N, Cin, H, W), dtype=jnp.float32)
    w = 0.1 * jax.random.normal(kw, (Cout, Cin, 3, 3), dtype=jnp.float32)
    b = 0.1 * jax.random.normal(kb, (Cout,), dtype=jnp.float32)
    gamma = 1.0 + 0.1 * jax.random.normal(kg, (Cout,), dtype=jnp.float32)
    beta = 0.1 * jax.random.normal(kbe, (Cout,), dtype=jnp.float32)

    out = jax.jit(down_block_2d)(x, w, b, gamma, beta)
    out = jax.block_until_ready(out)

    ref = down_block_2d_reference(x, w, b, gamma, beta)
    # bf16 MXU inputs + bf16 conv intermediate vs pure-f32 reference -> ~1e-2 tol
    np.testing.assert_allclose(np.asarray(out), np.asarray(ref),
                               rtol=2e-2, atol=2e-2)
    assert out.shape == (N, Cout, H // 2, W // 2)
    print("KERNEL_OK")
</pallas_src>

<mosaic_0001>
module attributes {stable_mosaic.version = 11 : i64} {
  func.func @conv_stats_kernel(%arg0: i32, %arg1: memref<512x128xbf16, #tpu.memory_space<vmem>>, %arg2: memref<128x128xbf16, #tpu.memory_space<vmem>>, %arg3: memref<512x128xbf16, #tpu.memory_space<vmem>>, %arg4: memref<8x128xf32, #tpu.memory_space<vmem>>) attributes {dimension_semantics = [#tpu.dimension_semantics<parallel>], iteration_bounds = array<i64: 1>, scalar_prefetch = 0 : i64, scratch_operands = 0 : i64, tpu.core_type = #tpu.core_type<tc>, window_params = [{transform_indices = @transform_0, window_bounds = array<i64: 512, 128>}, {pipeline_mode = #tpu.pipeline_mode<synchronous>, transform_indices = @transform_1, window_bounds = array<i64: 128, 128>}, {transform_indices = @transform_2, window_bounds = array<i64: 512, 128>}, {transform_indices = @transform_3, window_bounds = array<i64: 8, 128>}]} {
    %c0 = arith.constant 0 : index
    %c0_0 = arith.constant 0 : index
    %0 = vector.load %arg1[%c0, %c0_0] : memref<512x128xbf16, #tpu.memory_space<vmem>>, vector<512x128xbf16>
    %c0_1 = arith.constant 0 : index
    %c0_2 = arith.constant 0 : index
    %1 = vector.load %arg2[%c0_1, %c0_2] : memref<128x128xbf16, #tpu.memory_space<vmem>>, vector<128x128xbf16>
    %cst = arith.constant dense<0.000000e+00> : vector<512x128xf32>
    %2 = tpu.matmul %0, %1, %cst {dimension_numbers = #tpu.dot_dimension_numbers<[1], [0], [0], [1], [0, 0, 1, 1], [], []>} : vector<512x128xbf16>, vector<128x128xbf16>, vector<512x128xf32> -> vector<512x128xf32>
    %3 = arith.truncf %2 : vector<512x128xf32> to vector<512x128xbf16>
    %c0_3 = arith.constant 0 : index
    %c0_4 = arith.constant 0 : index
    %4 = vector.load %arg3[%c0_3, %c0_4] : memref<512x128xbf16, #tpu.memory_space<vmem>>, vector<512x128xbf16>
    tpu.vector_store %arg3[%c0_3, %c0_4], %3 {strides = array<i32>} : memref<512x128xbf16, #tpu.memory_space<vmem>>, vector<512x128xbf16>,
    %cst_5 = arith.constant dense<0.000000e+00> : vector<128xf32>
    %5 = vector.multi_reduction <add>, %2, %cst_5 [0] : vector<512x128xf32> to vector<128xf32>
    %6 = vector.shape_cast %5 : vector<128xf32> to vector<1x128xf32>
    %cst_6 = arith.constant 0.001953125 : f32
    %7 = vector.broadcast %cst_6 : f32 to vector<1x128xf32>
    %8 = arith.mulf %6, %7 : vector<1x128xf32>
    %9 = vector.broadcast %8 : vector<1x128xf32> to vector<512x128xf32>
    %10 = arith.subf %2, %9 : vector<512x128xf32>
    %11 = arith.mulf %10, %10 : vector<512x128xf32>
    %cst_7 = arith.constant dense<0.000000e+00> : vector<128xf32>
    %12 = vector.multi_reduction <add>, %11, %cst_7 [0] : vector<512x128xf32> to vector<128xf32>
    %13 = vector.shape_cast %12 : vector<128xf32> to vector<1x128xf32>
    %c0_8 = arith.constant 0 : index
    %c0_9 = arith.constant 0 : index
    %14 = vector.load %arg4[%c0_8, %c0_9] : memref<8x128xf32, #tpu.memory_space<vmem>>, vector<1x128xf32>
    tpu.vector_store %arg4[%c0_8, %c0_9], %6 {strides = array<i32>} : memref<8x128xf32, #tpu.memory_space<vmem>>, vector<1x128xf32>,
    %c1 = arith.constant 1 : index
    %c0_10 = arith.constant 0 : index
    %15 = vector.load %arg4[%c1, %c0_10] : memref<8x128xf32, #tpu.memory_space<vmem>>, vector<1x128xf32>
    tpu.vector_store %arg4[%c1, %c0_10], %13 {strides = array<i32>} : memref<8x128xf32, #tpu.memory_space<vmem>>, vector<1x128xf32>,
    return
  }
  func.func @transform_0(%arg0: i32) -> (i32, i32) {
    %c0_i32 = arith.constant 0 : i32
    %c0_i32_0 = arith.constant 0 : i32
    return %arg0, %c0_i32 : i32, i32
  }
  func.func @transform_1(%arg0: i32) -> (i32, i32) {
    %c0_i32 = arith.constant 0 : i32
    %c0_i32_0 = arith.constant 0 : i32
    %c0_i32_1 = arith.constant 0 : i32
    return %c0_i32, %c0_i32_0 : i32, i32
  }
  func.func @transform_2(%arg0: i32) -> (i32, i32) {
    %c0_i32 = arith.constant 0 : i32
    %c0_i32_0 = arith.constant 0 : i32
    return %arg0, %c0_i32 : i32, i32
  }
  func.func @transform_3(%arg0: i32) -> (i32, i32) {
    %c0_i32 = arith.constant 0 : i32
    %c0_i32_0 = arith.constant 0 : i32
    return %arg0, %c0_i32 : i32, i32
  }
}

module attributes {stable_mosaic.version = 11 : i64} {
  func.func @bn_relu_pool_kernel(%arg0: i32, %arg1: memref<16x2x8x256xbf16, #tpu.memory_space<vmem>>, %arg2: memref<1x256xf32, #tpu.memory_space<vmem>>, %arg3: memref<1x256xf32, #tpu.memory_space<vmem>>, %arg4: memref<16x8x128xf32, #tpu.memory_space<vmem>>) attributes {dimension_semantics = [#tpu.dimension_semantics<parallel>], iteration_bounds = array<i64: 1>, scalar_prefetch = 0 : i64, scratch_operands = 0 : i64, tpu.core_type = #tpu.core_type<tc>, window_params = [{transform_indices = @transform_0, window_bounds = array<i64: 16, 2, 8, 256>}, {pipeline_mode = #tpu.pipeline_mode<synchronous>, transform_indices = @transform_1, window_bounds = array<i64: 1, 256>}, {pipeline_mode = #tpu.pipeline_mode<synchronous>, transform_indices = @transform_2, window_bounds = array<i64: 1, 256>}, {transform_indices = @transform_3, window_bounds = array<i64: 16, 8, 128>}]} {
    %c0 = arith.constant 0 : index
    %c0_0 = arith.constant 0 : index
    %c0_1 = arith.constant 0 : index
    %c0_2 = arith.constant 0 : index
    %0 = vector.load %arg1[%c0, %c0_0, %c0_1, %c0_2] : memref<16x2x8x256xbf16, #tpu.memory_space<vmem>>, vector<16x2x8x256xbf16>
    %c0_3 = arith.constant 0 : index
    %c0_4 = arith.constant 0 : index
    %1 = vector.load %arg2[%c0_3, %c0_4] : memref<1x256xf32, #tpu.memory_space<vmem>>, vector<1x256xf32>
    %2 = arith.extf %0 : vector<16x2x8x256xbf16> to vector<16x2x8x256xf32>
    %3 = vector.shape_cast %1 : vector<1x256xf32> to vector<1x1x1x256xf32>
    %4 = vector.broadcast %3 : vector<1x1x1x256xf32> to vector<16x2x8x256xf32>
    %5 = arith.mulf %2, %4 : vector<16x2x8x256xf32>
    %c0_5 = arith.constant 0 : index
    %c0_6 = arith.constant 0 : index
    %6 = vector.load %arg3[%c0_5, %c0_6] : memref<1x256xf32, #tpu.memory_space<vmem>>, vector<1x256xf32>
    %7 = vector.shape_cast %6 : vector<1x256xf32> to vector<1x1x1x256xf32>
    %8 = vector.broadcast %7 : vector<1x1x1x256xf32> to vector<16x2x8x256xf32>
    %9 = arith.addf %5, %8 : vector<16x2x8x256xf32>
    %cst = arith.constant 0.000000e+00 : f32
    %10 = vector.broadcast %cst : f32 to vector<16x2x8x256xf32>
    %11 = arith.maximumf %9, %10 : vector<16x2x8x256xf32>
    %12 = vector.extract_strided_slice %11 {offsets = [0, 0, 0, 0], sizes = [16, 1, 8, 128], strides = [1, 1, 1, 1]} : vector<16x2x8x256xf32> to vector<16x1x8x128xf32>
    %13 = vector.shape_cast %12 : vector<16x1x8x128xf32> to vector<16x8x128xf32>
    %14 = vector.extract_strided_slice %11 {offsets = [0, 0, 0, 128], sizes = [16, 1, 8, 128], strides = [1, 1, 1, 1]} : vector<16x2x8x256xf32> to vector<16x1x8x128xf32>
    %15 = vector.shape_cast %14 : vector<16x1x8x128xf32> to vector<16x8x128xf32>
    %16 = arith.addf %13, %15 : vector<16x8x128xf32>
    %17 = vector.extract_strided_slice %11 {offsets = [0, 1, 0, 0], sizes = [16, 1, 8, 128], strides = [1, 1, 1, 1]} : vector<16x2x8x256xf32> to vector<16x1x8x128xf32>
    %18 = vector.shape_cast %17 : vector<16x1x8x128xf32> to vector<16x8x128xf32>
    %19 = arith.addf %16, %18 : vector<16x8x128xf32>
    %20 = vector.extract_strided_slice %11 {offsets = [0, 1, 0, 128], sizes = [16, 1, 8, 128], strides = [1, 1, 1, 1]} : vector<16x2x8x256xf32> to vector<16x1x8x128xf32>
    %21 = vector.shape_cast %20 : vector<16x1x8x128xf32> to vector<16x8x128xf32>
    %22 = arith.addf %19, %21 : vector<16x8x128xf32>
    %c0_7 = arith.constant 0 : index
    %c0_8 = arith.constant 0 : index
    %c0_9 = arith.constant 0 : index
    %23 = vector.load %arg4[%c0_7, %c0_8, %c0_9] : memref<16x8x128xf32, #tpu.memory_space<vmem>>, vector<16x8x128xf32>
    tpu.vector_store %arg4[%c0_7, %c0_8, %c0_9], %22 {strides = array<i32>} : memref<16x8x128xf32, #tpu.memory_space<vmem>>, vector<16x8x128xf32>,
    return
  }
  func.func @transform_0(%arg0: i32) -> (i32, i32, i32, i32) {
    %c0_i32 = arith.constant 0 : i32
    %c0_i32_0 = arith.constant 0 : i32
    %c0_i32_1 = arith.constant 0 : i32
    %c0_i32_2 = arith.constant 0 : i32
    return %arg0, %c0_i32, %c0_i32_0, %c0_i32_1 : i32, i32, i32, i32
  }
  func.func @transform_1(%arg0: i32) -> (i32, i32) {
    %c0_i32 = arith.constant 0 : i32
    %c0_i32_0 = arith.constant 0 : i32
    %c0_i32_1 = arith.constant 0 : i32
    return %c0_i32, %c0_i32_0 : i32, i32
  }
  func.func @transform_2(%arg0: i32) -> (i32, i32) {
    %c0_i32 = arith.constant 0 : i32
    %c0_i32_0 = arith.constant 0 : i32
    %c0_i32_1 = arith.constant 0 : i32
    return %c0_i32, %c0_i32_0 : i32, i32
  }
  func.func @transform_3(%arg0: i32) -> (i32, i32, i32) {
    %c0_i32 = arith.constant 0 : i32
    %c0_i32_0 = arith.constant 0 : i32
    %c0_i32_1 = arith.constant 0 : i32
    return %arg0, %c0_i32, %c0_i32_0 : i32, i32, i32
  }
}

</mosaic_0001>

<bundles_post_ra>
// kernel: down_block_2d.3
= control target key start
LH: loop header
LB: loop body
LE: loop exit
PB: predicated region body
PF: predicated region fallthrough
CT: control target
= control target key end

     0   :  { %s688_s0 = inlined_call_operand.vmem [shape: bf16[16,2,8,256], index: 0, kind: input, shape index: {}]   ;;  %s689_s1 = inlined_call_operand.vmem [shape: f32[1,256], index: 1, kind: input, shape index: {}]   ;;  %s690_s2 = inlined_call_operand.vmem [shape: f32[1,256], index: 2, kind: input, shape index: {}]   ;;  %s691_s3 = inlined_call_operand.vmem [shape: f32[16,8,128], index: 3, kind: output, shape index: {}]  }
   0x1   :  { %v14_v0 = vld [vmem:[%s688_s0] sm:$0xff]  ;;  %v15_v1 = vld [vmem:[%s688_s0 + $0x8] sm:$0xff]  ;;  %v16_v8 = vld [vmem:[%s688_s0 + $0x10] sm:$0xff] }
   0x2   :  { %v46_v2 = vld [vmem:[%s689_s1] sm:$0x3]  ;;  %v47_v3 = vunpack.c.l.bf16 %v14_v0  ;;  %v48_v4 = vunpack.c.h.bf16 %v14_v0  ;;  %v49_v5 = vunpack.c.l.bf16 %v15_v1  ;;  %v50_v6 = vunpack.c.h.bf16 %v15_v1  ;;  %v17_v9 = vld [vmem:[%s688_s0 + $0x18] sm:$0xff]  ;;  %v19_v35 = vld [vmem:[%s688_s0 + $0x28] sm:$0xff] }
   0x3   :  { %v180_v7 = vld [vmem:[%s690_s2] sm:$0x3]  ;;  %v420_v10 = vperm.slane %v46_v2, 0  ;;  %v422_v11 = vperm.slane %v46_v2, 1  ;;  %v51_v14 = vunpack.c.l.bf16 %v16_v8  ;;  %v52_v15 = vunpack.c.h.bf16 %v16_v8  ;;  %v20_v40 = vld [vmem:[%s688_s0 + $0x30] sm:$0xff]  ;;  %v21_v49 = vld [vmem:[%s688_s0 + $0x38] sm:$0xff] }
   0x4   :  { %v424_v12 = vperm.slane %v180_v7, 0  ;;  %v426_v13 = vperm.slane %v180_v7, 1  ;;  %v53_v16 = vunpack.c.l.bf16 %v17_v9  ;;  %v54_v17 = vunpack.c.h.bf16 %v17_v9  ;;  %v18_v34 = vld [vmem:[%s688_s0 + $0x20] sm:$0xff] }
   0x5   :  { %v116_v18 = vmul.f32 %v420_v10, %v47_v3  ;;  %v117_v19 = vmul.f32 %v422_v11, %v48_v4  ;;  %v118_v20 = vmul.f32 %v420_v10, %v49_v5  ;;  %v119_v21 = vmul.f32 %v422_v11, %v50_v6  ;;  %v22_v6 = vld [vmem:[%s688_s0 + $0x40] sm:$0xff] }
   0x6   :  { %v120_v22 = vmul.f32 %v420_v10, %v51_v14  ;;  %v121_v23 = vmul.f32 %v422_v11, %v52_v15  ;;  %v122_v24 = vmul.f32 %v420_v10, %v53_v16  ;;  %v123_v25 = vmul.f32 %v422_v11, %v54_v17  ;;  %v23_v15 = vld [vmem:[%s688_s0 + $0x48] sm:$0xff] }
   0x7   :  { %v186_v26 = vadd.f32 %v424_v12, %v116_v18  ;;  %v187_v27 = vadd.f32 %v426_v13, %v117_v19  ;;  %v188_v28 = vadd.f32 %v424_v12, %v118_v20  ;;  %v189_v29 = vadd.f32 %v426_v13, %v119_v21 }
   0x8   :  { %v190_v30 = vadd.f32 %v424_v12, %v120_v22  ;;  %v191_v31 = vadd.f32 %v426_v13, %v121_v23  ;;  %v192_v32 = vadd.f32 %v424_v12, %v122_v24  ;;  %v193_v33 = vadd.f32 %v426_v13, %v123_v25 }
   0x9   :  { %v250_v36 = vmax.f32 %v186_v26, 0.0  ;;  %v251_v37 = vmax.f32 %v187_v27, 0.0  ;;  %v252_v38 = vmax.f32 %v188_v28, 0.0  ;;  %v253_v39 = vmax.f32 %v189_v29, 0.0  ;;  %v24_v28 = vld [vmem:[%s688_s0 + $0x50] sm:$0xff] }
   0xa   :  { %v254_v41 = vmax.f32 %v190_v30, 0.0  ;;  %v255_v42 = vmax.f32 %v191_v31, 0.0  ;;  %v256_v43 = vmax.f32 %v192_v32, 0.0  ;;  %v257_v44 = vmax.f32 %v193_v33, 0.0 }
   0xb   :  { %v314_v45 = vadd.f32 %v251_v37, %v250_v36  ;;  %v55_v46 = vunpack.c.l.bf16 %v18_v34  ;;  %v56_v47 = vunpack.c.h.bf16 %v18_v34  ;;  %v57_v48 = vunpack.c.l.bf16 %v19_v35  ;;  %v25_v37 = vld [vmem:[%s688_s0 + $0x58] sm:$0xff] }
   0xc   :  { %v315_v50 = vadd.f32 %v255_v42, %v254_v41  ;;  %v58_v51 = vunpack.c.h.bf16 %v19_v35  ;;  %v59_v52 = vunpack.c.l.bf16 %v20_v40  ;;  %v60_v53 = vunpack.c.h.bf16 %v20_v40 }
   0xd   :  { %v330_v54 = vadd.f32 %v314_v45, %v252_v38  ;;  %v124_v55 = vmul.f32 %v420_v10, %v55_v46  ;;  %v125_v56 = vmul.f32 %v422_v11, %v56_v47  ;;  %v126_v57 = vmul.f32 %v420_v10, %v57_v48 }
   0xe   :  { %v331_v58 = vadd.f32 %v315_v50, %v256_v43  ;;  %v127_v59 = vmul.f32 %v422_v11, %v58_v51  ;;  %v61_v60 = vunpack.c.l.bf16 %v21_v49  ;;  %v62_v61 = vunpack.c.h.bf16 %v21_v49  ;;  %v26_v50 = vld [vmem:[%s688_s0 + $0x60] sm:$0xff] }
   0xf   :  { %v346_v62 = vadd.f32 %v330_v54, %v253_v39  ;;  %v194_v63 = vadd.f32 %v424_v12, %v124_v55  ;;  %v195_v0 = vadd.f32 %v426_v13, %v125_v56  ;;  %v196_v1 = vadd.f32 %v424_v12, %v126_v57  ;;  %v27_v55 = vld [vmem:[%s688_s0 + $0x68] sm:$0xff] }
  0x10   :  { %v347_v2 = vadd.f32 %v331_v58, %v257_v44  ;;  %v197_v3 = vadd.f32 %v426_v13, %v127_v59  ;;  %v128_v4 = vmul.f32 %v420_v10, %v59_v52  ;;  %v129_v5 = vmul.f32 %v422_v11, %v60_v53 }
  0x11   :  { %362 = vst [vmem:[%s691_s3] sm:$0xff] %v346_v62  ;;  %v258_v7 = vmax.f32 %v194_v63, 0.0  ;;  %v259_v8 = vmax.f32 %v195_v0, 0.0  ;;  %v260_v9 = vmax.f32 %v196_v1, 0.0  ;;  %v130_v14 = vmul.f32 %v420_v10, %v61_v60 }
  0x12   :  { %363 = vst [vmem:[%s691_s3 + $0x8] sm:$0xff] %v347_v2  ;;  %v261_v16 = vmax.f32 %v197_v3, 0.0  ;;  %v131_v17 = vmul.f32 %v422_v11, %v62_v61  ;;  %v198_v18 = vadd.f32 %v424_v12, %v128_v4  ;;  %v199_v19 = vadd.f32 %v426_v13, %v129_v5 }
  0x13   :  { %v316_v20 = vadd.f32 %v259_v8, %v258_v7  ;;  %v200_v21 = vadd.f32 %v424_v12, %v130_v14  ;;  %v63_v22 = vunpack.c.l.bf16 %v22_v6  ;;  %v64_v23 = vunpack.c.h.bf16 %v22_v6  ;;  %v28_v8 = vld [vmem:[%s688_s0 + $0x70] sm:$0xff] }
  0x14   :  { %v201_v24 = vadd.f32 %v426_v13, %v131_v17  ;;  %v262_v25 = vmax.f32 %v198_v18, 0.0  ;;  %v263_v26 = vmax.f32 %v199_v19, 0.0  ;;  %v65_v27 = vunpack.c.l.bf16 %v23_v15  ;;  %v29_v17 = vld [vmem:[%s688_s0 + $0x78] sm:$0xff] }
  0x15   :  { %v332_v29 = vadd.f32 %v316_v20, %v260_v9  ;;  %v264_v30 = vmax.f32 %v200_v21, 0.0  ;;  %v66_v31 = vunpack.c.h.bf16 %v23_v15  ;;  %v132_v32 = vmul.f32 %v420_v10, %v63_v22 }
  0x16   :  { %v265_v33 = vmax.f32 %v201_v24, 0.0  ;;  %v317_v34 = vadd.f32 %v263_v26, %v262_v25  ;;  %v133_v35 = vmul.f32 %v422_v11, %v64_v23  ;;  %v134_v36 = vmul.f32 %v420_v10, %v65_v27 }
  0x17   :  { %v348_v38 = vadd.f32 %v332_v29, %v261_v16  ;;  %v135_v39 = vmul.f32 %v422_v11, %v66_v31  ;;  %v202_v40 = vadd.f32 %v424_v12, %v132_v32  ;;  %v67_v41 = vunpack.c.l.bf16 %v24_v28 }
  0x18   :  { %v333_v42 = vadd.f32 %v317_v34, %v264_v30  ;;  %v203_v43 = vadd.f32 %v426_v13, %v133_v35  ;;  %v204_v44 = vadd.f32 %v424_v12, %v134_v36  ;;  %v68_v45 = vunpack.c.h.bf16 %v24_v28  ;;  %v30_v34 = vld [vmem:[%s688_s0 + $0x80] sm:$0xff] }
  0x19   :  { %364 = vst [vmem:[%s691_s3 + $0x10] sm:$0xff] %v348_v38  ;;  %v205_v46 = vadd.f32 %v426_v13, %v135_v39  ;;  %v266_v47 = vmax.f32 %v202_v40, 0.0  ;;  %v69_v48 = vunpack.c.l.bf16 %v25_v37  ;;  %v70_v49 = vunpack.c.h.bf16 %v25_v37  ;;  %v31_v39 = vld [vmem:[%s688_s0 + $0x88] sm:$0xff] }
  0x1a   :  { %v349_v51 = vadd.f32 %v333_v42, %v265_v33  ;;  %v267_v52 = vmax.f32 %v203_v43, 0.0  ;;  %v268_v53 = vmax.f32 %v204_v44, 0.0  ;;  %v136_v54 = vmul.f32 %v420_v10, %v67_v41 }
  0x1b   :  { %v269_v56 = vmax.f32 %v205_v46, 0.0  ;;  %v137_v57 = vmul.f32 %v422_v11, %v68_v45  ;;  %v138_v58 = vmul.f32 %v420_v10, %v69_v48  ;;  %v139_v59 = vmul.f32 %v422_v11, %v70_v49 }
  0x1c   :  { %365 = vst [vmem:[%s691_s3 + $0x18] sm:$0xff] %v349_v51  ;;  %v318_v60 = vadd.f32 %v267_v52, %v266_v47  ;;  %v206_v61 = vadd.f32 %v424_v12, %v136_v54  ;;  %v71_v62 = vunpack.c.l.bf16 %v26_v50  ;;  %v72_v63 = vunpack.c.h.bf16 %v26_v50  ;;  %v32_v52 = vld [vmem:[%s688_s0 + $0x90] sm:$0xff] }
  0x1d   :  { %v207_v0 = vadd.f32 %v426_v13, %v137_v57  ;;  %v208_v1 = vadd.f32 %v424_v12, %v138_v58  ;;  %v209_v2 = vadd.f32 %v426_v13, %v139_v59  ;;  %v73_v3 = vunpack.c.l.bf16 %v27_v55  ;;  %v33_v57 = vld [vmem:[%s688_s0 + $0x98] sm:$0xff] }
  0x1e   :  { %v334_v4 = vadd.f32 %v318_v60, %v268_v53  ;;  %v270_v5 = vmax.f32 %v206_v61, 0.0  ;;  %v74_v6 = vunpack.c.h.bf16 %v27_v55  ;;  %v140_v7 = vmul.f32 %v420_v10, %v71_v62 }
  0x1f   :  { %v271_v9 = vmax.f32 %v207_v0, 0.0  ;;  %v272_v14 = vmax.f32 %v208_v1, 0.0  ;;  %v273_v15 = vmax.f32 %v209_v2, 0.0  ;;  %v141_v16 = vmul.f32 %v422_v11, %v72_v63 }
  0x20   :  { %v350_v18 = vadd.f32 %v334_v4, %v269_v56  ;;  %v142_v19 = vmul.f32 %v420_v10, %v73_v3  ;;  %v143_v20 = vmul.f32 %v422_v11, %v74_v6  ;;  %v210_v21 = vadd.f32 %v424_v12, %v140_v7 }
  0x21   :  { %v319_v22 = vadd.f32 %v271_v9, %v270_v5  ;;  %v211_v23 = vadd.f32 %v426_v13, %v141_v16  ;;  %v75_v24 = vunpack.c.l.bf16 %v28_v8  ;;  %v76_v25 = vunpack.c.h.bf16 %v28_v8 }
  0x22   :  { %366 = vst [vmem:[%s691_s3 + $0x20] sm:$0xff] %v350_v18  ;;  %v212_v26 = vadd.f32 %v424_v12, %v142_v19  ;;  %v213_v27 = vadd.f32 %v426_v13, %v143_v20  ;;  %v274_v28 = vmax.f32 %v210_v21, 0.0  ;;  %v77_v29 = vunpack.c.l.bf16 %v29_v17  ;;  %v35_v19 = vld [vmem:[%s688_s0 + $0xa8] sm:$0xff] }
  0x23   :  { %v335_v30 = vadd.f32 %v319_v22, %v272_v14  ;;  %v275_v31 = vmax.f32 %v211_v23, 0.0  ;;  %v78_v32 = vunpack.c.h.bf16 %v29_v17  ;;  %v144_v33 = vmul.f32 %v420_v10, %v75_v24  ;;  %v34_v14 = vld [vmem:[%s688_s0 + $0xa0] sm:$0xff] }
  0x24   :  { %v276_v35 = vmax.f32 %v212_v26, 0.0  ;;  %v277_v36 = vmax.f32 %v213_v27, 0.0  ;;  %v145_v37 = vmul.f32 %v422_v11, %v76_v25  ;;  %v146_v38 = vmul.f32 %v420_v10, %v77_v29 }
  0x25   :  { %v351_v40 = vadd.f32 %v335_v30, %v273_v15  ;;  %v320_v41 = vadd.f32 %v275_v31, %v274_v28  ;;  %v147_v42 = vmul.f32 %v422_v11, %v78_v32  ;;  %v214_v43 = vadd.f32 %v424_v12, %v144_v33 }
  0x26   :  { %v215_v44 = vadd.f32 %v426_v13, %v145_v37  ;;  %v216_v45 = vadd.f32 %v424_v12, %v146_v38  ;;  %v79_v46 = vunpack.c.l.bf16 %v30_v34  ;;  %v80_v47 = vunpack.c.h.bf16 %v30_v34 }
  0x27   :  { %367 = vst [vmem:[%s691_s3 + $0x28] sm:$0xff] %v351_v40  ;;  %v336_v48 = vadd.f32 %v320_v41, %v276_v35  ;;  %v217_v49 = vadd.f32 %v426_v13, %v147_v42  ;;  %v278_v50 = vmax.f32 %v214_v43, 0.0  ;;  %v81_v51 = vunpack.c.l.bf16 %v31_v39  ;;  %v37_v41 = vld [vmem:[%s688_s0 + $0xb8] sm:$0xff] }
  0x28   :  { %v279_v53 = vmax.f32 %v215_v44, 0.0  ;;  %v280_v54 = vmax.f32 %v216_v45, 0.0  ;;  %v82_v55 = vunpack.c.h.bf16 %v31_v39  ;;  %v148_v56 = vmul.f32 %v420_v10, %v79_v46 }
  0x29   :  { %v352_v58 = vadd.f32 %v336_v48, %v277_v36  ;;  %v281_v59 = vmax.f32 %v217_v49, 0.0  ;;  %v149_v60 = vmul.f32 %v422_v11, %v80_v47  ;;  %v150_v61 = vmul.f32 %v420_v10, %v81_v51  ;;  %v36_v36 = vld [vmem:[%s688_s0 + $0xb0] sm:$0xff] }
  0x2a   :  { %v321_v62 = vadd.f32 %v279_v53, %v278_v50  ;;  %v151_v63 = vmul.f32 %v422_v11, %v82_v55  ;;  %v218_v0 = vadd.f32 %v424_v12, %v148_v56  ;;  %v83_v1 = vunpack.c.l.bf16 %v32_v52 }
  0x2b   :  { %368 = vst [vmem:[%s691_s3 + $0x30] sm:$0xff] %v352_v58  ;;  %v219_v2 = vadd.f32 %v426_v13, %v149_v60  ;;  %v220_v3 = vadd.f32 %v424_v12, %v150_v61  ;;  %v84_v4 = vunpack.c.h.bf16 %v32_v52  ;;  %v85_v5 = vunpack.c.l.bf16 %v33_v57  ;;  %v38_v58 = vld [vmem:[%s688_s0 + $0xc0] sm:$0xff] }
  0x2c   :  { %v337_v6 = vadd.f32 %v321_v62, %v280_v54  ;;  %v221_v7 = vadd.f32 %v426_v13, %v151_v63  ;;  %v282_v8 = vmax.f32 %v218_v0, 0.0  ;;  %v86_v9 = vunpack.c.h.bf16 %v33_v57 }
  0x2d   :  { %v283_v15 = vmax.f32 %v219_v2, 0.0  ;;  %v284_v16 = vmax.f32 %v220_v3, 0.0  ;;  %v152_v17 = vmul.f32 %v420_v10, %v83_v1  ;;  %v153_v18 = vmul.f32 %v422_v11, %v84_v4 }
  0x2e   :  { %v353_v20 = vadd.f32 %v337_v6, %v281_v59  ;;  %v285_v21 = vmax.f32 %v221_v7, 0.0  ;;  %v154_v22 = vmul.f32 %v420_v10, %v85_v5  ;;  %v155_v23 = vmul.f32 %v422_v11, %v86_v9  ;;  %v39_v59 = vld [vmem:[%s688_s0 + $0xc8] sm:$0xff] }
  0x2f   :  { %v322_v24 = vadd.f32 %v283_v15, %v282_v8  ;;  %v222_v25 = vadd.f32 %v424_v12, %v152_v17  ;;  %v223_v26 = vadd.f32 %v426_v13, %v153_v18  ;;  %v87_v27 = vunpack.c.l.bf16 %v34_v14 }
  0x30   :  { %369 = vst [vmem:[%s691_s3 + $0x38] sm:$0xff] %v353_v20  ;;  %v224_v28 = vadd.f32 %v424_v12, %v154_v22  ;;  %v225_v29 = vadd.f32 %v426_v13, %v155_v23  ;;  %v88_v30 = vunpack.c.h.bf16 %v34_v14  ;;  %v89_v31 = vunpack.c.l.bf16 %v35_v19  ;;  %v40_v20 = vld [vmem:[%s688_s0 + $0xd0] sm:$0xff] }
  0x31   :  { %v338_v32 = vadd.f32 %v322_v24, %v284_v16  ;;  %v286_v33 = vmax.f32 %v222_v25, 0.0  ;;  %v287_v34 = vmax.f32 %v223_v26, 0.0  ;;  %v90_v35 = vunpack.c.h.bf16 %v35_v19 }
  0x32   :  { %v288_v37 = vmax.f32 %v224_v28, 0.0  ;;  %v289_v38 = vmax.f32 %v225_v29, 0.0  ;;  %v156_v39 = vmul.f32 %v420_v10, %v87_v27  ;;  %v157_v40 = vmul.f32 %v422_v11, %v88_v30 }
  0x33   :  { %v354_v42 = vadd.f32 %v338_v32, %v285_v21  ;;  %v323_v43 = vadd.f32 %v287_v34, %v286_v33  ;;  %v158_v44 = vmul.f32 %v420_v10, %v89_v31  ;;  %v159_v45 = vmul.f32 %v422_v11, %v90_v35  ;;  %v41_v21 = vld [vmem:[%s688_s0 + $0xd8] sm:$0xff] }
  0x34   :  { %v226_v46 = vadd.f32 %v424_v12, %v156_v39  ;;  %v227_v47 = vadd.f32 %v426_v13, %v157_v40  ;;  %v91_v48 = vunpack.c.l.bf16 %v36_v36  ;;  %v92_v49 = vunpack.c.h.bf16 %v36_v36 }
  0x35   :  { %370 = vst [vmem:[%s691_s3 + $0x40] sm:$0xff] %v354_v42  ;;  %v339_v50 = vadd.f32 %v323_v43, %v288_v37  ;;  %v228_v51 = vadd.f32 %v424_v12, %v158_v44  ;;  %v229_v52 = vadd.f32 %v426_v13, %v159_v45  ;;  %v93_v53 = vunpack.c.l.bf16 %v37_v41  ;;  %v43_v43 = vld [vmem:[%s688_s0 + $0xe8] sm:$0xff] }
  0x36   :  { %v290_v54 = vmax.f32 %v226_v46, 0.0  ;;  %v291_v55 = vmax.f32 %v227_v47, 0.0  ;;  %v94_v56 = vunpack.c.h.bf16 %v37_v41  ;;  %v160_v57 = vmul.f32 %v420_v10, %v91_v48 }
  0x37   :  { %v355_v60 = vadd.f32 %v339_v50, %v289_v38  ;;  %v292_v61 = vmax.f32 %v228_v51, 0.0  ;;  %v293_v62 = vmax.f32 %v229_v52, 0.0  ;;  %v161_v63 = vmul.f32 %v422_v11, %v92_v49  ;;  %v42_v38 = vld [vmem:[%s688_s0 + $0xe0] sm:$0xff] }
  0x38   :  { %v324_v0 = vadd.f32 %v291_v55, %v290_v54  ;;  %v162_v1 = vmul.f32 %v420_v10, %v93_v53  ;;  %v163_v2 = vmul.f32 %v422_v11, %v94_v56  ;;  %v230_v3 = vadd.f32 %v424_v12, %v160_v57 }
  0x39   :  { %371 = vst [vmem:[%s691_s3 + $0x48] sm:$0xff] %v355_v60  ;;  %v231_v4 = vadd.f32 %v426_v13, %v161_v63  ;;  %v95_v5 = vunpack.c.l.bf16 %v38_v58  ;;  %v96_v6 = vunpack.c.h.bf16 %v38_v58  ;;  %v97_v7 = vunpack.c.l.bf16 %v39_v59  ;;  %v44_v60 = vld [vmem:[%s688_s0 + $0xf0] sm:$0xff] }
  0x3a   :  { %v340_v8 = vadd.f32 %v324_v0, %v292_v61  ;;  %v232_v9 = vadd.f32 %v424_v12, %v162_v1  ;;  %v233_v14 = vadd.f32 %v426_v13, %v163_v2  ;;  %v294_v15 = vmax.f32 %v230_v3, 0.0  ;;  %v45_v1 = vld [vmem:[%s688_s0 + $0xf8] sm:$0xff] }
  0x3b   :  { %v295_v16 = vmax.f32 %v231_v4, 0.0  ;;  %v98_v17 = vunpack.c.h.bf16 %v39_v59  ;;  %v164_v18 = vmul.f32 %v420_v10, %v95_v5  ;;  %v165_v19 = vmul.f32 %v422_v11, %v96_v6 }
  0x3c   :  { %v356_v22 = vadd.f32 %v340_v8, %v293_v62  ;;  %v296_v23 = vmax.f32 %v232_v9, 0.0  ;;  %v297_v24 = vmax.f32 %v233_v14, 0.0  ;;  %v166_v25 = vmul.f32 %v420_v10, %v97_v7 }
  0x3d   :  { %v325_v26 = vadd.f32 %v295_v16, %v294_v15  ;;  %v167_v27 = vmul.f32 %v422_v11, %v98_v17  ;;  %v234_v28 = vadd.f32 %v424_v12, %v164_v18  ;;  %v235_v29 = vadd.f32 %v426_v13, %v165_v19 }
  0x3e   :  { %372 = vst [vmem:[%s691_s3 + $0x50] sm:$0xff] %v356_v22  ;;  %v236_v30 = vadd.f32 %v424_v12, %v166_v25  ;;  %v99_v31 = vunpack.c.l.bf16 %v40_v20  ;;  %v100_v32 = vunpack.c.h.bf16 %v40_v20  ;;  %v101_v33 = vunpack.c.l.bf16 %v41_v21 }
  0x3f   :  { %v341_v34 = vadd.f32 %v325_v26, %v296_v23  ;;  %v237_v35 = vadd.f32 %v426_v13, %v167_v27  ;;  %v298_v36 = vmax.f32 %v234_v28, 0.0  ;;  %v299_v37 = vmax.f32 %v235_v29, 0.0 }
  0x40   :  { %v300_v39 = vmax.f32 %v236_v30, 0.0  ;;  %v102_v40 = vunpack.c.h.bf16 %v41_v21  ;;  %v168_v41 = vmul.f32 %v420_v10, %v99_v31  ;;  %v169_v42 = vmul.f32 %v422_v11, %v100_v32 }
  0x41   :  { %v357_v44 = vadd.f32 %v341_v34, %v297_v24  ;;  %v301_v45 = vmax.f32 %v237_v35, 0.0  ;;  %v326_v46 = vadd.f32 %v299_v37, %v298_v36  ;;  %v170_v47 = vmul.f32 %v420_v10, %v101_v33 }
  0x42   :  { %v171_v48 = vmul.f32 %v422_v11, %v102_v40  ;;  %v238_v49 = vadd.f32 %v424_v12, %v168_v41  ;;  %v239_v50 = vadd.f32 %v426_v13, %v169_v42  ;;  %v103_v51 = vunpack.c.l.bf16 %v42_v38 }
  0x43   :  { %373 = vst [vmem:[%s691_s3 + $0x58] sm:$0xff] %v357_v44  ;;  %v342_v52 = vadd.f32 %v326_v46, %v300_v39  ;;  %v240_v53 = vadd.f32 %v424_v12, %v170_v47  ;;  %v104_v54 = vunpack.c.h.bf16 %v42_v38  ;;  %v105_v55 = vunpack.c.l.bf16 %v43_v43 }
  0x44   :  { %v241_v56 = vadd.f32 %v426_v13, %v171_v48  ;;  %v302_v57 = vmax.f32 %v238_v49, 0.0  ;;  %v303_v58 = vmax.f32 %v239_v50, 0.0  ;;  %v106_v59 = vunpack.c.h.bf16 %v43_v43 }
  0x45   :  { %v358_v61 = vadd.f32 %v342_v52, %v301_v45  ;;  %v304_v62 = vmax.f32 %v240_v53, 0.0  ;;  %v172_v63 = vmul.f32 %v420_v10, %v103_v51  ;;  %v173_v0 = vmul.f32 %v422_v11, %v104_v54 }
  0x46   :  { %v305_v2 = vmax.f32 %v241_v56, 0.0  ;;  %v327_v3 = vadd.f32 %v303_v58, %v302_v57  ;;  %v174_v4 = vmul.f32 %v420_v10, %v105_v55  ;;  %v175_v5 = vmul.f32 %v422_v11, %v106_v59 }
  0x47   :  { %374 = vst [vmem:[%s691_s3 + $0x60] sm:$0xff] %v358_v61  ;;  %v242_v6 = vadd.f32 %v424_v12, %v172_v63  ;;  %v243_v7 = vadd.f32 %v426_v13, %v173_v0  ;;  %v107_v8 = vunpack.c.l.bf16 %v44_v60  ;;  %v108_v9 = vunpack.c.h.bf16 %v44_v60 }
  0x48   :  { %v343_v14 = vadd.f32 %v327_v3, %v304_v62  ;;  %v244_v15 = vadd.f32 %v424_v12, %v174_v4  ;;  %v245_v16 = vadd.f32 %v426_v13, %v175_v5  ;;  %v109_v17 = vunpack.c.l.bf16 %v45_v1 }
  0x49   :  { %v306_v18 = vmax.f32 %v242_v6, 0.0  ;;  %v307_v19 = vmax.f32 %v243_v7, 0.0  ;;  %v110_v20 = vunpack.c.h.bf16 %v45_v1  ;;  %v176_v21 = vmul.f32 %v420_v10, %v107_v8 }
  0x4a   :  { %v359_v22 = vadd.f32 %v343_v14, %v305_v2  ;;  %v308_v23 = vmax.f32 %v244_v15, 0.0  ;;  %v309_v24 = vmax.f32 %v245_v16, 0.0  ;;  %v177_v25 = vmul.f32 %v422_v11, %v108_v9 }
  0x4b   :  { %v328_v26 = vadd.f32 %v307_v19, %v306_v18  ;;  %v178_v27 = vmul.f32 %v420_v10, %v109_v17  ;;  %v179_v28 = vmul.f32 %v422_v11, %v110_v20  ;;  %v246_v29 = vadd.f32 %v424_v12, %v176_v21 }
  0x4c   :  { %375 = vst [vmem:[%s691_s3 + $0x68] sm:$0xff] %v359_v22  ;;  %v247_v30 = vadd.f32 %v426_v13, %v177_v25 }
  0x4d   :  { %v344_v31 = vadd.f32 %v328_v26, %v308_v23  ;;  %v248_v32 = vadd.f32 %v424_v12, %v178_v27  ;;  %v249_v33 = vadd.f32 %v426_v13, %v179_v28  ;;  %v310_v34 = vmax.f32 %v246_v29, 0.0 }
  0x4e   :  { %v311_v35 = vmax.f32 %v247_v30, 0.0 }
  0x4f   :  { %v360_v36 = vadd.f32 %v344_v31, %v309_v24  ;;  %v312_v37 = vmax.f32 %v248_v32, 0.0  ;;  %v313_v10 = vmax.f32 %v249_v33, 0.0 }
  0x50   :  { %v329_v38 = vadd.f32 %v311_v35, %v310_v34 }
  0x51   :  { %376 = vst [vmem:[%s691_s3 + $0x70] sm:$0xff] %v360_v36 }
  0x52   :  { %v345_v11 = vadd.f32 %v329_v38, %v312_v37 }
  0x54   :  { %v361_v39 = vadd.f32 %v345_v11, %v313_v10 }
  0x56   :  { %377 = vst [vmem:[%s691_s3 + $0x78] sm:$0xff] %v361_v39 }

// kernel: down_block_2d.2
= control target key start
LH: loop header
LB: loop body
LE: loop exit
PB: predicated region body
PF: predicated region fallthrough
CT: control target
= control target key end

     0   :  { %s1950_s1 = inlined_call_operand.vmem [shape: bf16[128,128], index: 1, kind: input, shape index: {}]   ;;  %s1951_s0 = inlined_call_operand.vmem [shape: bf16[512,128], index: 0, kind: input, shape index: {}]   ;;  %s1952_s2 = inlined_call_operand.vmem [shape: bf16[512,128], index: 2, kind: output, shape index: {0}]   ;;  %s1953_s3 = inlined_call_operand.vmem [shape: f32[8,128], index: 3, kind: output, shape index: {1}]  }
   0x1   :  { %v1106_v0 = vld [vmem:[%s1950_s1 + $0x38] sm:$0xff]  ;;  %v1105_v1 = vld [vmem:[%s1950_s1 + $0x30] sm:$0xff]  ;;  %v1104_v2 = vld [vmem:[%s1950_s1 + $0x28] sm:$0xff] }
   0x2   :  { %333 = vmatpush.bf16.msra.mxu0 %v1106_v0  ;;  %1298 = vmatpush.bf16.msra.mxu1 %v1106_v0  ;;  %v1103_v3 = vld [vmem:[%s1950_s1 + $0x20] sm:$0xff]  ;;  %v1102_v4 = vld [vmem:[%s1950_s1 + $0x18] sm:$0xff]  ;;  %v1101_v5 = vld [vmem:[%s1950_s1 + $0x10] sm:$0xff] }
   0x3   :  { %1299 = vmatpush.bf16.msra.mxu2 %v1106_v0  ;;  %1300 = vmatpush.bf16.msra.mxu3 %v1106_v0  ;;  %v1100_v6 = vld [vmem:[%s1950_s1 + $0x8] sm:$0xff]  ;;  %v1099_v7 = vld [vmem:[%s1950_s1] sm:$0xff]  ;;  %v1069_v13 = vld [vmem:[%s1951_s0 + $0x10] sm:$0xff] }
   0x4   :  { %v1067_v8 = vld [vmem:[%s1951_s0] sm:$0xff]  ;;  %v1068_v10 = vld [vmem:[%s1951_s0 + $0x8] sm:$0xff]  ;;  %v1077_v14 = vld [vmem:[%s1951_s0 + $0x50] sm:$0xff] }
   0x5   :  { %v1075_v9 = vld [vmem:[%s1951_s0 + $0x40] sm:$0xff]  ;;  %v1076_v11 = vld [vmem:[%s1951_s0 + $0x48] sm:$0xff]  ;;  %v1070_v16 = vld [vmem:[%s1951_s0 + $0x18] sm:$0xff] }
   0x6   :  { %334 = vmatpush.bf16.msra.mxu0 %v1105_v1  ;;  %1301 = vmatpush.bf16.msra.mxu1 %v1105_v1  ;;  %v1083_v12 = vld [vmem:[%s1951_s0 + $0x80] sm:$0xff]  ;;  %v1084_v15 = vld [vmem:[%s1951_s0 + $0x88] sm:$0xff]  ;;  %v1078_v17 = vld [vmem:[%s1951_s0 + $0x58] sm:$0xff] }
   0x7   :  { %1302 = vmatpush.bf16.msra.mxu2 %v1105_v1  ;;  %1303 = vmatpush.bf16.msra.mxu3 %v1105_v1  ;;  %v1085_v18 = vld [vmem:[%s1951_s0 + $0x90] sm:$0xff]  ;;  %v1091_v19 = vld [vmem:[%s1951_s0 + $0xc0] sm:$0xff]  ;;  %v1086_v22 = vld [vmem:[%s1951_s0 + $0x98] sm:$0xff] }
   0x8   :  { %v1071_v20 = vld [vmem:[%s1951_s0 + $0x20] sm:$0xff]  ;;  %v1092_v23 = vld [vmem:[%s1951_s0 + $0xc8] sm:$0xff]  ;;  %v1093_v27 = vld [vmem:[%s1951_s0 + $0xd0] sm:$0xff] }
   0x9   :  { %v1079_v21 = vld [vmem:[%s1951_s0 + $0x60] sm:$0xff]  ;;  %v1072_v24 = vld [vmem:[%s1951_s0 + $0x28] sm:$0xff]  ;;  %v1073_v28 = vld [vmem:[%s1951_s0 + $0x30] sm:$0xff] }
   0xa   :  { %335 = vmatpush.bf16.msra.mxu0 %v1104_v2  ;;  %1304 = vmatpush.bf16.msra.mxu1 %v1104_v2  ;;  %v1080_v25 = vld [vmem:[%s1951_s0 + $0x68] sm:$0xff]  ;;  %v1087_v26 = vld [vmem:[%s1951_s0 + $0xa0] sm:$0xff]  ;;  %v1081_v29 = vld [vmem:[%s1951_s0 + $0x70] sm:$0xff] }
   0xb   :  { %1305 = vmatpush.bf16.msra.mxu2 %v1104_v2  ;;  %1306 = vmatpush.bf16.msra.mxu3 %v1104_v2  ;;  %v1088_v30 = vld [vmem:[%s1951_s0 + $0xa8] sm:$0xff]  ;;  %v1094_v31 = vld [vmem:[%s1951_s0 + $0xd8] sm:$0xff]  ;;  %v1089_v34 = vld [vmem:[%s1951_s0 + $0xb0] sm:$0xff] }
   0xc   :  { %v1074_v32 = vld [vmem:[%s1951_s0 + $0x38] sm:$0xff]  ;;  %v1095_v35 = vld [vmem:[%s1951_s0 + $0xe0] sm:$0xff]  ;;  %v1096_v39 = vld [vmem:[%s1951_s0 + $0xe8] sm:$0xff] }
   0xd   :  { %v1082_v33 = vld [vmem:[%s1951_s0 + $0x78] sm:$0xff]  ;;  %v1097_v46 = vld [vmem:[%s1951_s0 + $0xf0] sm:$0xff] }
   0xe   :  { %336 = vmatpush.bf16.msra.mxu0 %v1103_v3  ;;  %1307 = vmatpush.bf16.msra.mxu1 %v1103_v3  ;;  %v1090_v38 = vld [vmem:[%s1951_s0 + $0xb8] sm:$0xff] }
   0xf   :  { %1308 = vmatpush.bf16.msra.mxu2 %v1103_v3  ;;  %1309 = vmatpush.bf16.msra.mxu3 %v1103_v3  ;;  %v1098_v55 = vld [vmem:[%s1951_s0 + $0xf8] sm:$0xff] }
  0x12   :  { %337 = vmatpush.bf16.msra.mxu0 %v1102_v4  ;;  %1310 = vmatpush.bf16.msra.mxu1 %v1102_v4 }
  0x13   :  { %1311 = vmatpush.bf16.msra.mxu2 %v1102_v4  ;;  %1312 = vmatpush.bf16.msra.mxu3 %v1102_v4 }
  0x16   :  { %338 = vmatpush.bf16.msra.mxu0 %v1101_v5  ;;  %1313 = vmatpush.bf16.msra.mxu1 %v1101_v5 }
  0x17   :  { %1314 = vmatpush.bf16.msra.mxu2 %v1101_v5  ;;  %1315 = vmatpush.bf16.msra.mxu3 %v1101_v5 }
  0x1a   :  { %339 = vmatpush.bf16.msra.mxu0 %v1100_v6  ;;  %1316 = vmatpush.bf16.msra.mxu1 %v1100_v6 }
  0x1b   :  { %1317 = vmatpush.bf16.msra.mxu2 %v1100_v6  ;;  %1318 = vmatpush.bf16.msra.mxu3 %v1100_v6 }
  0x1e   :  { %340 = vmatpush.bf16.msra.mxu0 %v1099_v7  ;;  %1319 = vmatpush.bf16.msra.mxu1 %v1099_v7 }
  0x1f   :  { %1320 = vmatpush.bf16.msra.mxu2 %v1099_v7  ;;  %1321 = vmatpush.bf16.msra.mxu3 %v1099_v7 }
  0x21   :  { %341 = vmatmul.bf16.vlgmr.msra.gmra.mxu0 %v1067_v8  ;;  %381 = vmatmul.bf16.vlgmr.msra.gmra.mxu1 %v1075_v9 }
  0x22   :  { %421 = vmatmul.bf16.vlgmr.msra.gmra.mxu2 %v1083_v12  ;;  %461 = vmatmul.bf16.vlgmr.msra.gmra.mxu3 %v1091_v19 }
  0x31   :  { %346 = vmatmul.bf16.gmra.mxu0 %v1068_v10  ;;  %386 = vmatmul.bf16.gmra.mxu1 %v1076_v11 }
  0x32   :  { %426 = vmatmul.bf16.gmra.mxu2 %v1084_v15  ;;  %466 = vmatmul.bf16.gmra.mxu3 %v1092_v23 }
  0x41   :  { %351 = vmatmul.bf16.gmra.mxu0 %v1069_v13  ;;  %391 = vmatmul.bf16.gmra.mxu1 %v1077_v14 }
  0x42   :  { %431 = vmatmul.bf16.gmra.mxu2 %v1085_v18  ;;  %471 = vmatmul.bf16.gmra.mxu3 %v1093_v27 }
  0x51   :  { %356 = vmatmul.bf16.gmra.mxu0 %v1070_v16  ;;  %396 = vmatmul.bf16.gmra.mxu1 %v1078_v17 }
  0x52   :  { %436 = vmatmul.bf16.gmra.mxu2 %v1086_v22  ;;  %476 = vmatmul.bf16.gmra.mxu3 %v1094_v31 }
  0x61   :  { %361 = vmatmul.bf16.gmra.mxu0 %v1071_v20  ;;  %401 = vmatmul.bf16.gmra.mxu1 %v1079_v21 }
  0x62   :  { %441 = vmatmul.bf16.gmra.mxu2 %v1087_v26  ;;  %481 = vmatmul.bf16.gmra.mxu3 %v1095_v35 }
  0x71   :  { %366 = vmatmul.bf16.gmra.mxu0 %v1072_v24  ;;  %406 = vmatmul.bf16.gmra.mxu1 %v1080_v25 }
  0x72   :  { %446 = vmatmul.bf16.gmra.mxu2 %v1088_v30  ;;  %486 = vmatmul.bf16.gmra.mxu3 %v1096_v39 }
  0x81   :  { %371 = vmatmul.bf16.gmra.mxu0 %v1073_v28  ;;  %411 = vmatmul.bf16.gmra.mxu1 %v1081_v29 }
  0x82   :  { %451 = vmatmul.bf16.gmra.mxu2 %v1089_v34  ;;  %491 = vmatmul.bf16.gmra.mxu3 %v1097_v46 }
  0x91   :  { %376 = vmatmul.bf16.gmra.mxu0 %v1074_v32  ;;  %416 = vmatmul.bf16.gmra.mxu1 %v1082_v33 }
  0x92   :  { %456 = vmatmul.bf16.gmra.mxu2 %v1090_v38  ;;  %496 = vmatmul.bf16.gmra.mxu3 %v1098_v55 }
  0x9e   :  { %v1450_v36 = vpop.f32.mrf.mxu0  ;;  %v1452_v37 = vpop.f32.mrf.mxu1 }
  0xa5   :  { %v1489_v51 = vpop.f32.mrf.mxu2  ;;  %v1548_v7 = vpop.f32.mrf.mxu3 }
  0xa6   :  { %v1460_v40 = vpop.f32.mrf.mxu0  ;;  %v1462_v41 = vpop.f32.mrf.mxu1 }
  0xa7   :  { %v1110_v42 = vpack.c.bf16 %v1460_v40, %v1450_v36  ;;  %v1150_v43 = vpack.c.bf16 %v1462_v41, %v1452_v37  ;;  %v630_v32 = vadd.f32 %v1460_v40, %v1450_v36 }
  0xa9   :  { %1111 = vst [vmem:[%s1952_s2] sm:$0xff] %v1110_v42  }
  0xaa   :  { %1274 = vst [vmem:[%s1952_s2 + $0x40] sm:$0xff] %v1150_v43  }
  0xad   :  { %v1501_v54 = vpop.f32.mrf.mxu2  ;;  %v1562_v11 = vpop.f32.mrf.mxu3 }
  0xae   :  { %v1474_v44 = vpop.f32.mrf.mxu0  ;;  %v1476_v45 = vpop.f32.mrf.mxu1  ;;  %v1190_v56 = vpack.c.bf16 %v1501_v54, %v1489_v51  ;;  %v1230_v13 = vpack.c.bf16 %v1562_v11, %v1548_v7 }
  0xaf   :  { %1968 = vst [vmem:[#allocation2_spill] sm:$0xff] %v1476_v45  ;;  %v631_v33 = vadd.f32 %v630_v32, %v1474_v44 }
  0xb0   :  { %1282 = vst [vmem:[%s1952_s2 + $0x80] sm:$0xff] %v1190_v56  }
  0xb1   :  { %1290 = vst [vmem:[%s1952_s2 + $0xc0] sm:$0xff] %v1230_v13  }
  0xb5   :  { %v1519_v61 = vpop.f32.mrf.mxu2  ;;  %v1584_v19 = vpop.f32.mrf.mxu3 }
  0xb6   :  { %v1481_v47 = vpop.f32.mrf.mxu0  ;;  %v1483_v48 = vpop.f32.mrf.mxu1 }
  0xb7   :  { %1969 = vst [vmem:[#allocation3_spill] sm:$0xff] %v1483_v48  ;;  %v1115_v49 = vpack.c.bf16 %v1481_v47, %v1474_v44  ;;  %v1155_v50 = vpack.c.bf16 %v1483_v48, %v1476_v45  ;;  %v632_v38 = vadd.f32 %v631_v33, %v1481_v47 }
  0xb9   :  { %1267 = vst [vmem:[%s1952_s2 + $0x8] sm:$0xff] %v1115_v49  }
  0xba   :  { %1275 = vst [vmem:[%s1952_s2 + $0x48] sm:$0xff] %v1155_v50  }
  0xbd   :  { %v1531_v0 = vpop.f32.mrf.mxu2  ;;  %v1598_v23 = vpop.f32.mrf.mxu3 }
  0xbe   :  { %v1497_v52 = vpop.f32.mrf.mxu0  ;;  %v1499_v53 = vpop.f32.mrf.mxu1  ;;  %1972 = vst [vmem:[#allocation6_spill] sm:$0xff] %v1531_v0  ;;  %v1195_v1 = vpack.c.bf16 %v1531_v0, %v1519_v61  ;;  %v1235_v25 = vpack.c.bf16 %v1598_v23, %v1584_v19 }
  0xbf   :  { %1970 = vst [vmem:[#allocation4_spill] sm:$0xff] %v1499_v53  ;;  %v633_v49 = vadd.f32 %v632_v38, %v1497_v52 }
  0xc0   :  { %1283 = vst [vmem:[%s1952_s2 + $0x88] sm:$0xff] %v1195_v1  }
  0xc1   :  { %1291 = vst [vmem:[%s1952_s2 + $0xc8] sm:$0xff] %v1235_v25  }
  0xc5   :  { %v1546_v6 = vpop.f32.mrf.mxu2  ;;  %v1620_v31 = vpop.f32.mrf.mxu3 }
  0xc6   :  { %v1511_v57 = vpop.f32.mrf.mxu0  ;;  %v1513_v58 = vpop.f32.mrf.mxu1  ;;  %1973 = vst [vmem:[#allocation7_spill] sm:$0xff] %v1546_v6 }
  0xc7   :  { %1971 = vst [vmem:[#allocation5_spill] sm:$0xff] %v1513_v58  ;;  %v1120_v59 = vpack.c.bf16 %v1511_v57, %v1497_v52  ;;  %v1160_v60 = vpack.c.bf16 %v1513_v58, %v1499_v53  ;;  %v634_v50 = vadd.f32 %v633_v49, %v1511_v57 }
  0xc9   :  { %1268 = vst [vmem:[%s1952_s2 + $0x10] sm:$0xff] %v1120_v59  }
  0xca   :  { %1276 = vst [vmem:[%s1952_s2 + $0x50] sm:$0xff] %v1160_v60  }
  0xcd   :  { %v1560_v10 = vpop.f32.mrf.mxu2  ;;  %v1638_v42 = vpop.f32.mrf.mxu3 }
  0xce   :  { %v1527_v62 = vpop.f32.mrf.mxu0  ;;  %v1529_v63 = vpop.f32.mrf.mxu1  ;;  %v1200_v12 = vpack.c.bf16 %v1560_v10, %v1546_v6  ;;  %1977 = vst [vmem:[#allocation11_spill] sm:$0xff] %v1638_v42  ;;  %v1240_v46 = vpack.c.bf16 %v1638_v42, %v1620_v31 }
  0xcf   :  { %v635_v55 = vadd.f32 %v634_v50, %v1527_v62 }
  0xd0   :  { %1284 = vst [vmem:[%s1952_s2 + $0x90] sm:$0xff] %v1200_v12  }
  0xd1   :  { %1292 = vst [vmem:[%s1952_s2 + $0xd0] sm:$0xff] %v1240_v46  }
  0xd5   :  { %v1582_v18 = vpop.f32.mrf.mxu2  ;;  %v1664_v12 = vpop.f32.mrf.mxu3 }
  0xd6   :  { %v1538_v2 = vpop.f32.mrf.mxu0  ;;  %v1540_v3 = vpop.f32.mrf.mxu1  ;;  %1978 = vst [vmem:[#allocation12_spill] sm:$0xff] %v1664_v12 }
  0xd7   :  { %v1125_v4 = vpack.c.bf16 %v1538_v2, %v1527_v62  ;;  %v1165_v5 = vpack.c.bf16 %v1540_v3, %v1529_v63  ;;  %v636_v60 = vadd.f32 %v635_v55, %v1538_v2 }
  0xd9   :  { %1269 = vst [vmem:[%s1952_s2 + $0x18] sm:$0xff] %v1125_v4  }
  0xda   :  { %1277 = vst [vmem:[%s1952_s2 + $0x58] sm:$0xff] %v1165_v5  }
  0xdd   :  { %v1596_v22 = vpop.f32.mrf.mxu2  ;;  %v1682_v32 = vpop.f32.mrf.mxu3 }
  0xde   :  { %v1556_v8 = vpop.f32.mrf.mxu0  ;;  %v1558_v9 = vpop.f32.mrf.mxu1  ;;  %v1205_v24 = vpack.c.bf16 %v1596_v22, %v1582_v18  ;;  %1980 = vst [vmem:[#allocation14_spill] sm:$0xff] %v1682_v32  ;;  %v1245_v38 = vpack.c.bf16 %v1682_v32, %v1664_v12 }
  0xdf   :  { %v637_v13 = vadd.f32 %v636_v60, %v1556_v8 }
  0xe0   :  { %1285 = vst [vmem:[%s1952_s2 + $0x98] sm:$0xff] %v1205_v24  }
  0xe1   :  { %1293 = vst [vmem:[%s1952_s2 + $0xd8] sm:$0xff] %v1245_v38  }
  0xe5   :  { %v1618_v30 = vpop.f32.mrf.mxu2 }
  0xe6   :  { %v1574_v14 = vpop.f32.mrf.mxu0  ;;  %v1576_v15 = vpop.f32.mrf.mxu1 }
  0xe7   :  { %v1130_v16 = vpack.c.bf16 %v1574_v14, %v1556_v8  ;;  %v1170_v17 = vpack.c.bf16 %v1576_v15, %v1558_v9 }
  0xe9   :  { %1270 = vst [vmem:[%s1952_s2 + $0x20] sm:$0xff] %v1130_v16   ;;  %v638_v16 = vadd.f32 %v637_v13, %v1574_v14 }
  0xea   :  { %1278 = vst [vmem:[%s1952_s2 + $0x60] sm:$0xff] %v1170_v17  }
  0xed   :  { %v1636_v39 = vpop.f32.mrf.mxu2 }
  0xee   :  { %v1592_v20 = vpop.f32.mrf.mxu0  ;;  %v1594_v21 = vpop.f32.mrf.mxu1  ;;  %v1210_v43 = vpack.c.bf16 %v1636_v39, %v1618_v30 }
  0xef   :  { %1974 = vst [vmem:[#allocation8_spill] sm:$0xff] %v1594_v21  ;;  %v639_v17 = vadd.f32 %v638_v16, %v1592_v20  ;;  %v1708_v16 = vpop.f32.mrf.mxu3 }
  0xf0   :  { %1286 = vst [vmem:[%s1952_s2 + $0xa0] sm:$0xff] %v1210_v43  }
  0xf5   :  { %v1662_v5 = vpop.f32.mrf.mxu2 }
  0xf6   :  { %v1610_v26 = vpop.f32.mrf.mxu0  ;;  %v1612_v27 = vpop.f32.mrf.mxu1 }
  0xf7   :  { %1975 = vst [vmem:[#allocation9_spill] sm:$0xff] %v1612_v27  ;;  %v1135_v28 = vpack.c.bf16 %v1610_v26, %v1592_v20  ;;  %v1175_v29 = vpack.c.bf16 %v1612_v27, %v1594_v21 }
  0xf9   :  { %1271 = vst [vmem:[%s1952_s2 + $0x28] sm:$0xff] %v1135_v28   ;;  %v640_v28 = vadd.f32 %v639_v17, %v1610_v26 }
  0xfa   :  { %1279 = vst [vmem:[%s1952_s2 + $0x68] sm:$0xff] %v1175_v29  }
  0xfd   :  { %v1680_v29 = vpop.f32.mrf.mxu2 }
  0xfe   :  { %v1631_v34 = vpop.f32.mrf.mxu0  ;;  %v1633_v35 = vpop.f32.mrf.mxu1  ;;  %1979 = vst [vmem:[#allocation13_spill] sm:$0xff] %v1680_v29  ;;  %v1215_v33 = vpack.c.bf16 %v1680_v29, %v1662_v5 }
  0xff   :  { %1976 = vst [vmem:[#allocation10_spill] sm:$0xff] %v1633_v35  ;;  %v641_v43 = vadd.f32 %v640_v28, %v1631_v34 }
 0x100   :  { %1287 = vst [vmem:[%s1952_s2 + $0xa8] sm:$0xff] %v1215_v33  }
 0x105   :  { %v1706_v13 = vpop.f32.mrf.mxu2 }
 0x106   :  { %v1653_v56 = vpop.f32.mrf.mxu0  ;;  %v1655_v59 = vpop.f32.mrf.mxu1  ;;  %1981 = vst [vmem:[#allocation15_spill] sm:$0xff] %v1706_v13 }
 0x107   :  { %v1140_v1 = vpack.c.bf16 %v1653_v56, %v1631_v34  ;;  %v1180_v4 = vpack.c.bf16 %v1655_v59, %v1633_v35  ;;  %v642_v46 = vadd.f32 %v641_v43, %v1653_v56 }
 0x109   :  { %1272 = vst [vmem:[%s1952_s2 + $0x30] sm:$0xff] %v1140_v1  }
 0x10a   :  { %1280 = vst [vmem:[%s1952_s2 + $0x70] sm:$0xff] %v1180_v4  }
 0x10d   :  { %v1720_v43 = vpop.f32.mrf.mxu2 }
 0x10e   :  { %v1675_v24 = vpop.f32.mrf.mxu0  ;;  %v1677_v25 = vpop.f32.mrf.mxu1 }
 0x10f   :  { %v643_v49 = vadd.f32 %v642_v46, %v1675_v24  ;;  %v1722_v46 = vpop.f32.mrf.mxu3 }
 0x116   :  { %v1697_v50 = vpop.f32.mrf.mxu0  ;;  %v1699_v55 = vpop.f32.mrf.mxu1 }
 0x117   :  { %v1145_v60 = vpack.c.bf16 %v1697_v50, %v1675_v24  ;;  %v644_v1 = vadd.f32 %v643_v49, %v1697_v50  ;;  %v1185_v4 = vpack.c.bf16 %v1699_v55, %v1677_v25  ;;  %v1220_v49 = vpack.c.bf16 %v1720_v43, %v1706_v13 }
 0x119   :  { %1273 = vst [vmem:[%s1952_s2 + $0x38] sm:$0xff] %v1145_v60   ;;  %v645_v17 = vadd.f32 %v644_v1, %v1452_v37  ;;  %v1250_v60 = vpack.c.bf16 %v1722_v46, %v1708_v16 }
 0x11a   :  { %1281 = vst [vmem:[%s1952_s2 + $0x78] sm:$0xff] %v1185_v4  }
 0x11b   :  { %v646_v28 = vadd.f32 %v645_v17, %v1462_v41  ;;  %1288 = vst [vmem:[%s1952_s2 + $0xb0] sm:$0xff] %v1220_v49  }
 0x11c   :  { %1294 = vst [vmem:[%s1952_s2 + $0xe0] sm:$0xff] %v1250_v60  }
 0x11d   :  { %v647_v33 = vadd.f32 %v646_v28, %v1476_v45 }
 0x11f   :  { %v648_v38 = vadd.f32 %v647_v33, %v1483_v48  ;;  %v1738_v33 = vpop.f32.mrf.mxu2  ;;  %v1740_v48 = vpop.f32.mrf.mxu3 }
 0x121   :  { %v649_v1 = vadd.f32 %v648_v38, %v1499_v53 }
 0x123   :  { %v650_v4 = vadd.f32 %v649_v1, %v1513_v58 }
 0x125   :  { %v651_v17 = vadd.f32 %v650_v4, %v1529_v63 }
 0x127   :  { %v652_v28 = vadd.f32 %v651_v17, %v1540_v3  ;;  %v1746_v58 = vpop.f32.mrf.mxu2  ;;  %v1748_v45 = vpop.f32.mrf.mxu3 }
 0x128   :  { %v1225_v60 = vpack.c.bf16 %v1746_v58, %v1738_v33  ;;  %v1255_v4 = vpack.c.bf16 %v1748_v45, %v1740_v48 }
 0x129   :  { %v653_v38 = vadd.f32 %v652_v28, %v1558_v9 }
 0x12a   :  { %1289 = vst [vmem:[%s1952_s2 + $0xb8] sm:$0xff] %v1225_v60  }
 0x12b   :  { %v654_v53 = vadd.f32 %v653_v38, %v1576_v15  ;;  %1295 = vst [vmem:[%s1952_s2 + $0xe8] sm:$0xff] %v1255_v4  }
 0x12d   :  { %v655_v49 = vadd.f32 %v654_v53, %v1594_v21 }
 0x12f   :  { %v656_v1 = vadd.f32 %v655_v49, %v1612_v27  ;;  %v1764_v49 = vpop.f32.mrf.mxu3 }
 0x131   :  { %v657_v17 = vadd.f32 %v656_v1, %v1633_v35 }
 0x133   :  { %v658_v53 = vadd.f32 %v657_v17, %v1655_v59 }
 0x135   :  { %v659_v28 = vadd.f32 %v658_v53, %v1677_v25 }
 0x137   :  { %v660_v38 = vadd.f32 %v659_v28, %v1699_v55  ;;  %v1770_v21 = vpop.f32.mrf.mxu3 }
 0x138   :  { %v1260_v17 = vpack.c.bf16 %v1770_v21, %v1764_v49 }
 0x139   :  { %v661_v27 = vadd.f32 %v660_v38, %v1489_v51 }
 0x13a   :  { %1296 = vst [vmem:[%s1952_s2 + $0xf0] sm:$0xff] %v1260_v17  }
 0x13b   :  { %v662_v1 = vadd.f32 %v661_v27, %v1501_v54 }
 0x13d   :  { %v663_v35 = vadd.f32 %v662_v1, %v1519_v61 }
 0x13f   :  { %v664_v60 = vadd.f32 %v663_v35, %v1531_v0  ;;  %v1781_v38 = vpop.f32.mrf.mxu3 }
 0x141   :  { %v665_v4 = vadd.f32 %v664_v60, %v1546_v6 }
 0x143   :  { %v666_v53 = vadd.f32 %v665_v4, %v1560_v10 }
 0x145   :  { %v667_v28 = vadd.f32 %v666_v53, %v1582_v18 }
 0x147   :  { %v668_v27 = vadd.f32 %v667_v28, %v1596_v22  ;;  %v1787_v6 = vpop.f32.mrf.mxu3 }
 0x148   :  { %v1265_v17 = vpack.c.bf16 %v1787_v6, %v1781_v38 }
 0x149   :  { %v669_v35 = vadd.f32 %v668_v27, %v1618_v30 }
 0x14a   :  { %1297 = vst [vmem:[%s1952_s2 + $0xf8] sm:$0xff] %v1265_v17  }
 0x14b   :  { %v670_v1 = vadd.f32 %v669_v35, %v1636_v39 }
 0x14d   :  { %v671_v0 = vadd.f32 %v670_v1, %v1662_v5 }
 0x14f   :  { %v672_v60 = vadd.f32 %v671_v0, %v1680_v29 }
 0x151   :  { %v673_v4 = vadd.f32 %v672_v60, %v1706_v13 }
 0x153   :  { %v674_v53 = vadd.f32 %v673_v4, %v1720_v43 }
 0x155   :  { %v675_v28 = vadd.f32 %v674_v53, %v1738_v33 }
 0x157   :  { %v676_v27 = vadd.f32 %v675_v28, %v1746_v58 }
 0x159   :  { %v677_v35 = vadd.f32 %v676_v27, %v1548_v7 }
 0x15b   :  { %v678_v0 = vadd.f32 %v677_v35, %v1562_v11 }
 0x15d   :  { %v679_v1 = vadd.f32 %v678_v0, %v1584_v19 }
 0x15f   :  { %v680_v29 = vadd.f32 %v679_v1, %v1598_v23 }
 0x161   :  { %v681_v60 = vadd.f32 %v680_v29, %v1620_v31 }
 0x163   :  { %v682_v13 = vadd.f32 %v681_v60, %v1638_v42 }
 0x165   :  { %v683_v17 = vadd.f32 %v682_v13, %v1664_v12 }
 0x167   :  { %v684_v4 = vadd.f32 %v683_v17, %v1682_v32 }
 0x169   :  { %v685_v53 = vadd.f32 %v684_v4, %v1708_v16 }
 0x16b   :  { %v686_v28 = vadd.f32 %v685_v53, %v1722_v46 }
 0x16d   :  { %v687_v27 = vadd.f32 %v686_v28, %v1740_v48 }
 0x16f   :  { %v688_v35 = vadd.f32 %v687_v27, %v1748_v45 }
 0x171   :  { %v689_v0 = vadd.f32 %v688_v35, %v1764_v49 }
 0x173   :  { %v690_v1 = vadd.f32 %v689_v0, %v1770_v21 }
 0x175   :  { %v691_v29 = vadd.f32 %v690_v1, %v1781_v38 }
 0x177   :  { %v692_v60 = vadd.f32 %v691_v29, %v1787_v6 }
 0x179   :  { %v693_v42 = vrot.slane %v692_v60, 4 }
 0x17b   :  { %v694_v13 = vadd.f32 %v693_v42, %v692_v60 }
 0x17d   :  { %v695_v12 = vrot.slane %v694_v13, 2 }
 0x17f   :  { %v696_v17 = vadd.f32 %v695_v12, %v694_v13 }
 0x181   :  { %v697_v32 = vrot.slane %v696_v17, 1 }
 0x183   :  { %v698_v4 = vadd.f32 %v697_v32, %v696_v17 }
 0x185   :  { %897 = vst [vmem:[%s1953_s3] sm:$0x1] %v698_v4  ;;  %v1817_v53 = vmul.f32 0.001953125, %v698_v4 }
 0x187   :  { %v700_v28 = vsub.f32 %v1450_v36, %v1817_v53  ;;  %v701_v27 = vsub.f32 %v1460_v40, %v1817_v53  ;;  %v702_v35 = vsub.f32 %v1474_v44, %v1817_v53  ;;  %v703_v12 = vsub.f32 %v1481_v47, %v1817_v53 }
 0x188   :  { %v704_v32 = vsub.f32 %v1497_v52, %v1817_v53  ;;  %v705_v60 = vsub.f32 %v1511_v57, %v1817_v53  ;;  %v706_v40 = vsub.f32 %v1527_v62, %v1817_v53  ;;  %v707_v4 = vsub.f32 %v1538_v2, %v1817_v53 }
 0x189   :  { %v764_v42 = vmul.f32 %v700_v28, %v700_v28  ;;  %v765_v0 = vmul.f32 %v701_v27, %v701_v27  ;;  %v766_v1 = vmul.f32 %v702_v35, %v702_v35  ;;  %v767_v36 = vmul.f32 %v703_v12, %v703_v12 }
 0x18a   :  { %v768_v17 = vmul.f32 %v704_v32, %v704_v32  ;;  %v769_v28 = vmul.f32 %v705_v60, %v705_v60  ;;  %v708_v52 = vsub.f32 %v1556_v8, %v1817_v53  ;;  %v770_v27 = vmul.f32 %v706_v40, %v706_v40 }
 0x18b   :  { %v828_v29 = vadd.f32 %v765_v0, %v764_v42  ;;  %v709_v57 = vsub.f32 %v1574_v14, %v1817_v53  ;;  %v771_v42 = vmul.f32 %v707_v4, %v707_v4  ;;  %v710_v62 = vsub.f32 %v1592_v20, %v1817_v53 }
 0x18c   :  { %v772_v12 = vmul.f32 %v708_v52, %v708_v52  ;;  %v711_v2 = vsub.f32 %v1610_v26, %v1817_v53  ;;  %v712_v8 = vsub.f32 %v1631_v34, %v1817_v53  ;;  %v713_v14 = vsub.f32 %v1653_v56, %v1817_v53 }
 0x18d   :  { %v829_v13 = vadd.f32 %v828_v29, %v766_v1  ;;  %v773_v1 = vmul.f32 %v709_v57, %v709_v57  ;;  %v774_v60 = vmul.f32 %v710_v62, %v710_v62  ;;  %v714_v20 = vsub.f32 %v1675_v24, %v1817_v53  ;;  %v1982_v57 = vld [vmem:[#allocation2_spill] sm:$0xff]  ;;  %v1983_v62 = vld [vmem:[#allocation3_spill] sm:$0xff] }
 0x18e   :  { %v715_v26 = vsub.f32 %v1697_v50, %v1817_v53  ;;  %v777_v4 = vmul.f32 %v713_v14, %v713_v14  ;;  %v716_v34 = vsub.f32 %v1452_v37, %v1817_v53  ;;  %v717_v56 = vsub.f32 %v1462_v41, %v1817_v53 }
 0x18f   :  { %v830_v44 = vadd.f32 %v829_v13, %v767_v36  ;;  %v775_v13 = vmul.f32 %v711_v2, %v711_v2  ;;  %v718_v24 = vsub.f32 %v1982_v57, %v1817_v53  ;;  %v719_v50 = vsub.f32 %v1983_v62, %v1817_v53  ;;  %v1984_v2 = vld [vmem:[#allocation4_spill] sm:$0xff]  ;;  %v1987_v57 = vld [vmem:[#allocation9_spill] sm:$0xff] }
 0x190   :  { %v720_v37 = vsub.f32 %v1984_v2, %v1817_v53  ;;  %v722_v14 = vsub.f32 %v1529_v63, %v1817_v53  ;;  %v730_v2 = vsub.f32 %v1677_v25, %v1817_v53  ;;  %v734_v25 = vsub.f32 %v1519_v61, %v1817_v53 }
 0x191   :  { %v831_v47 = vadd.f32 %v830_v44, %v768_v17  ;;  %v776_v17 = vmul.f32 %v712_v8, %v712_v8  ;;  %v1985_v8 = vld [vmem:[#allocation5_spill] sm:$0xff]  ;;  %v738_v61 = vsub.f32 %v1582_v18, %v1817_v53  ;;  %v742_v18 = vsub.f32 %v1662_v5, %v1817_v53 }
 0x192   :  { %v721_v41 = vsub.f32 %v1985_v8, %v1817_v53  ;;  %v746_v5 = vsub.f32 %v1738_v33, %v1817_v53  ;;  %v750_v33 = vsub.f32 %v1584_v19, %v1817_v53 }
 0x193   :  { %v832_v35 = vadd.f32 %v831_v47, %v769_v28  ;;  %v778_v47 = vmul.f32 %v714_v20, %v714_v20  ;;  %v723_v20 = vsub.f32 %v1540_v3, %v1817_v53  ;;  %v727_v3 = vsub.f32 %v1987_v57, %v1817_v53 }
 0x195   :  { %v833_v0 = vadd.f32 %v832_v35, %v770_v27  ;;  %v779_v27 = vmul.f32 %v715_v26, %v715_v26  ;;  %v724_v26 = vsub.f32 %v1558_v9, %v1817_v53 }
 0x197   :  { %v834_v32 = vadd.f32 %v833_v0, %v771_v42  ;;  %v780_v42 = vmul.f32 %v716_v34, %v716_v34  ;;  %v725_v34 = vsub.f32 %v1576_v15, %v1817_v53  ;;  %v729_v15 = vsub.f32 %v1655_v59, %v1817_v53 }
 0x198   :  { %v733_v59 = vsub.f32 %v1501_v54, %v1817_v53  ;;  %v737_v54 = vsub.f32 %v1560_v10, %v1817_v53  ;;  %v741_v10 = vsub.f32 %v1636_v39, %v1817_v53  ;;  %v745_v39 = vsub.f32 %v1720_v43, %v1817_v53 }
 0x199   :  { %v835_v29 = vadd.f32 %v834_v32, %v772_v12  ;;  %v781_v12 = vmul.f32 %v717_v56, %v717_v56  ;;  %v1986_v56 = vld [vmem:[#allocation8_spill] sm:$0xff]  ;;  %v793_v8 = vmul.f32 %v729_v15, %v729_v15  ;;  %v749_v43 = vsub.f32 %v1562_v11, %v1817_v53 }
 0x19a   :  { %v726_v63 = vsub.f32 %v1986_v56, %v1817_v53  ;;  %v801_v57 = vmul.f32 %v737_v54, %v737_v54 }
 0x19b   :  { %v836_v36 = vadd.f32 %v835_v29, %v773_v1  ;;  %v782_v1 = vmul.f32 %v718_v24, %v718_v24  ;;  %v789_v24 = vmul.f32 %v725_v34, %v725_v34  ;;  %v798_v34 = vmul.f32 %v734_v25, %v734_v25 }
 0x19c   :  { %v790_v62 = vmul.f32 %v726_v63, %v726_v63  ;;  %v810_v25 = vmul.f32 %v746_v5, %v746_v5 }
 0x19d   :  { %v837_v40 = vadd.f32 %v836_v36, %v774_v60  ;;  %v783_v60 = vmul.f32 %v719_v50, %v719_v50 }
 0x19f   :  { %v838_v44 = vadd.f32 %v837_v40, %v775_v13  ;;  %v784_v13 = vmul.f32 %v720_v37, %v720_v37 }
 0x1a1   :  { %v839_v28 = vadd.f32 %v838_v44, %v776_v17  ;;  %v785_v17 = vmul.f32 %v721_v41, %v721_v41 }
 0x1a3   :  { %v840_v52 = vadd.f32 %v839_v28, %v777_v4  ;;  %v786_v4 = vmul.f32 %v722_v14, %v722_v14 }
 0x1a5   :  { %v841_v35 = vadd.f32 %v840_v52, %v778_v47  ;;  %v787_v47 = vmul.f32 %v723_v20, %v723_v20 }
 0x1a7   :  { %v842_v0 = vadd.f32 %v841_v35, %v779_v27  ;;  %v788_v27 = vmul.f32 %v724_v26, %v724_v26  ;;  %v797_v26 = vmul.f32 %v733_v59, %v733_v59  ;;  %v809_v59 = vmul.f32 %v745_v39, %v745_v39 }
 0x1a9   :  { %v843_v32 = vadd.f32 %v842_v0, %v780_v42  ;;  %v1988_v0 = vld [vmem:[#allocation10_spill] sm:$0xff] }
 0x1aa   :  { %v728_v9 = vsub.f32 %v1988_v0, %v1817_v53 }
 0x1ab   :  { %v844_v29 = vadd.f32 %v843_v32, %v781_v12  ;;  %v791_v12 = vmul.f32 %v727_v3, %v727_v3 }
 0x1ac   :  { %v792_v37 = vmul.f32 %v728_v9, %v728_v9 }
 0x1ad   :  { %v845_v36 = vadd.f32 %v844_v29, %v782_v1  ;;  %v731_v29 = vsub.f32 %v1699_v55, %v1817_v53 }
 0x1af   :  { %v846_v40 = vadd.f32 %v845_v36, %v783_v60  ;;  %v732_v60 = vsub.f32 %v1489_v51, %v1817_v53  ;;  %v794_v36 = vmul.f32 %v730_v2, %v730_v2 }
 0x1b1   :  { %v847_v44 = vadd.f32 %v846_v40, %v784_v13  ;;  %v795_v13 = vmul.f32 %v731_v29, %v731_v29  ;;  %v796_v20 = vmul.f32 %v732_v60, %v732_v60 }
 0x1b3   :  { %v848_v28 = vadd.f32 %v847_v44, %v785_v17  ;;  %v1989_v44 = vld [vmem:[#allocation6_spill] sm:$0xff] }
 0x1b4   :  { %v735_v55 = vsub.f32 %v1989_v44, %v1817_v53 }
 0x1b5   :  { %v849_v52 = vadd.f32 %v848_v28, %v786_v4  ;;  %v1990_v28 = vld [vmem:[#allocation7_spill] sm:$0xff] }
 0x1b6   :  { %v736_v51 = vsub.f32 %v1990_v28, %v1817_v53 }
 0x1b7   :  { %v850_v35 = vadd.f32 %v849_v52, %v787_v47  ;;  %v799_v52 = vmul.f32 %v735_v55, %v735_v55 }
 0x1b8   :  { %v800_v63 = vmul.f32 %v736_v51, %v736_v51  ;;  %v814_v51 = vmul.f32 %v750_v33, %v750_v33 }
 0x1b9   :  { %v851_v42 = vadd.f32 %v850_v35, %v788_v27  ;;  %v739_v35 = vsub.f32 %v1596_v22, %v1817_v53 }
 0x1bb   :  { %v852_v50 = vadd.f32 %v851_v42, %v789_v24  ;;  %v740_v24 = vsub.f32 %v1618_v30, %v1817_v53  ;;  %v802_v42 = vmul.f32 %v738_v61, %v738_v61  ;;  %v803_v9 = vmul.f32 %v739_v35, %v739_v35 }
 0x1bd   :  { %v853_v32 = vadd.f32 %v852_v50, %v790_v62  ;;  %v804_v50 = vmul.f32 %v740_v24, %v740_v24 }
 0x1bf   :  { %v854_v1 = vadd.f32 %v853_v32, %v791_v12  ;;  %v1991_v12 = vld [vmem:[#allocation13_spill] sm:$0xff]  ;;  %v805_v32 = vmul.f32 %v741_v10, %v741_v10 }
 0x1c0   :  { %v743_v22 = vsub.f32 %v1991_v12, %v1817_v53 }
 0x1c1   :  { %v855_v41 = vadd.f32 %v854_v1, %v792_v37  ;;  %v1992_v37 = vld [vmem:[#allocation15_spill] sm:$0xff]  ;;  %v806_v1 = vmul.f32 %v742_v18, %v742_v18 }
 0x1c2   :  { %v744_v30 = vsub.f32 %v1992_v37, %v1817_v53 }
 0x1c3   :  { %v856_v14 = vadd.f32 %v855_v41, %v793_v8  ;;  %v807_v8 = vmul.f32 %v743_v22, %v743_v22 }
 0x1c4   :  { %v808_v60 = vmul.f32 %v744_v30, %v744_v30 }
 0x1c5   :  { %v857_v40 = vadd.f32 %v856_v14, %v794_v36  ;;  %v747_v14 = vsub.f32 %v1746_v58, %v1817_v53  ;;  %v751_v58 = vsub.f32 %v1598_v23, %v1817_v53 }
 0x1c7   :  { %v858_v17 = vadd.f32 %v857_v40, %v795_v13  ;;  %v748_v40 = vsub.f32 %v1548_v7, %v1817_v53  ;;  %v752_v7 = vsub.f32 %v1620_v31, %v1817_v53  ;;  %v815_v54 = vmul.f32 %v751_v58, %v751_v58 }
 0x1c8   :  { %v756_v31 = vsub.f32 %v1708_v16, %v1817_v53  ;;  %v760_v16 = vsub.f32 %v1764_v49, %v1817_v53 }
 0x1c9   :  { %v859_v4 = vadd.f32 %v858_v17, %v796_v20  ;;  %v811_v17 = vmul.f32 %v747_v14, %v747_v14  ;;  %v812_v55 = vmul.f32 %v748_v40, %v748_v40  ;;  %v816_v61 = vmul.f32 %v752_v7, %v752_v7 }
 0x1ca   :  { %v824_v30 = vmul.f32 %v760_v16, %v760_v16 }
 0x1cb   :  { %v860_v47 = vadd.f32 %v859_v4, %v797_v26  ;;  %v813_v4 = vmul.f32 %v749_v43, %v749_v43 }
 0x1cd   :  { %v861_v56 = vadd.f32 %v860_v47, %v798_v34  ;;  %v1993_v47 = vld [vmem:[#allocation11_spill] sm:$0xff] }
 0x1ce   :  { %v753_v11 = vsub.f32 %v1993_v47, %v1817_v53 }
 0x1cf   :  { %v862_v27 = vadd.f32 %v861_v56, %v799_v52  ;;  %v1994_v56 = vld [vmem:[#allocation12_spill] sm:$0xff] }
 0x1d0   :  { %v754_v19 = vsub.f32 %v1994_v56, %v1817_v53  ;;  %v817_v35 = vmul.f32 %v753_v11, %v753_v11 }
 0x1d1   :  { %v863_v3 = vadd.f32 %v862_v27, %v800_v63  ;;  %v1995_v27 = vld [vmem:[#allocation14_spill] sm:$0xff] }
 0x1d2   :  { %v755_v23 = vsub.f32 %v1995_v27, %v1817_v53 }
 0x1d3   :  { %v864_v0 = vadd.f32 %v863_v3, %v801_v57  ;;  %v818_v3 = vmul.f32 %v754_v19, %v754_v19 }
 0x1d5   :  { %v865_v62 = vadd.f32 %v864_v0, %v802_v42  ;;  %v757_v42 = vsub.f32 %v1722_v46, %v1817_v53  ;;  %v819_v0 = vmul.f32 %v755_v23, %v755_v23  ;;  %v761_v46 = vsub.f32 %v1770_v21, %v1817_v53 }
 0x1d7   :  { %v866_v15 = vadd.f32 %v865_v62, %v803_v9  ;;  %v758_v9 = vsub.f32 %v1740_v48, %v1817_v53  ;;  %v820_v62 = vmul.f32 %v756_v31, %v756_v31  ;;  %v762_v48 = vsub.f32 %v1781_v38, %v1817_v53 }
 0x1d9   :  { %v867_v2 = vadd.f32 %v866_v15, %v804_v50  ;;  %v759_v50 = vsub.f32 %v1748_v45, %v1817_v53  ;;  %v821_v15 = vmul.f32 %v757_v42, %v757_v42  ;;  %v822_v22 = vmul.f32 %v758_v9, %v758_v9 }
 0x1da   :  { %v763_v45 = vsub.f32 %v1787_v6, %v1817_v53 }
 0x1db   :  { %v868_v29 = vadd.f32 %v867_v2, %v805_v32  ;;  %v823_v2 = vmul.f32 %v759_v50, %v759_v50 }
 0x1dc   :  { %v827_v49 = vmul.f32 %v763_v45, %v763_v45 }
 0x1dd   :  { %v869_v41 = vadd.f32 %v868_v29, %v806_v1  ;;  %v825_v29 = vmul.f32 %v761_v46, %v761_v46 }
 0x1df   :  { %v870_v36 = vadd.f32 %v869_v41, %v807_v8  ;;  %v826_v8 = vmul.f32 %v762_v48, %v762_v48 }
 0x1e1   :  { %v871_v13 = vadd.f32 %v870_v36, %v808_v60 }
 0x1e3   :  { %v872_v20 = vadd.f32 %v871_v13, %v809_v59 }
 0x1e5   :  { %v873_v44 = vadd.f32 %v872_v20, %v810_v25 }
 0x1e7   :  { %v874_v26 = vadd.f32 %v873_v44, %v811_v17 }
 0x1e9   :  { %v875_v28 = vadd.f32 %v874_v26, %v812_v55 }
 0x1eb   :  { %v876_v34 = vadd.f32 %v875_v28, %v813_v4 }
 0x1ed   :  { %v877_v52 = vadd.f32 %v876_v34, %v814_v51 }
 0x1ef   :  { %v878_v63 = vadd.f32 %v877_v52, %v815_v54 }
 0x1f1   :  { %v879_v57 = vadd.f32 %v878_v63, %v816_v61 }
 0x1f3   :  { %v880_v24 = vadd.f32 %v879_v57, %v817_v35 }
 0x1f5   :  { %v881_v10 = vadd.f32 %v880_v24, %v818_v3 }
 0x1f7   :  { %v882_v18 = vadd.f32 %v881_v10, %v819_v0 }
 0x1f9   :  { %v883_v12 = vadd.f32 %v882_v18, %v820_v62 }
 0x1fb   :  { %v884_v32 = vadd.f32 %v883_v12, %v821_v15 }
 0x1fd   :  { %v885_v37 = vadd.f32 %v884_v32, %v822_v22 }
 0x1ff   :  { %v886_v1 = vadd.f32 %v885_v37, %v823_v2 }
 0x201   :  { %v887_v39 = vadd.f32 %v886_v1, %v824_v30 }
 0x203   :  { %v888_v41 = vadd.f32 %v887_v39, %v825_v29 }
 0x205   :  { %v889_v5 = vadd.f32 %v888_v41, %v826_v8 }
 0x207   :  { %v890_v60 = vadd.f32 %v889_v5, %v827_v49 }
 0x209   :  { %v891_v36 = vrot.slane %v890_v60, 4 }
 0x20b   :  { %v892_v14 = vadd.f32 %v891_v36, %v890_v60 }
 0x20d   :  { %v893_v21 = vrot.slane %v892_v14, 2 }
 0x20f   :  { %v894_v59 = vadd.f32 %v893_v21, %v892_v14 }
 0x211   :  { %v895_v13 = vrot.slane %v894_v59, 1 }
 0x213   :  { %v896_v40 = vadd.f32 %v895_v13, %v894_v59 }
 0x215   :  { %898 = vst [vmem:[%s1953_s3 + $0x1] sm:$0x1] %v896_v40 }

</bundles_post_ra>
